<compile_context>
chip_gen: v5e
topology: v5e:2x2
jax: 0.10.0
libtpu: 0.0.40
codegen_flags: <defaults>
</compile_context>

<pallas_src>
import functools

import jax
import jax.numpy as jnp
from jax.experimental import pallas as pl
from jax.experimental.pallas import tpu as pltpu


_LANE = 128                            # lane width / padding alignment
_DEFAULT_VMEM = 64 * 1024 * 1024       # conservative fallback (v7x per-TC physical VMEM)


# ------------------------------- small helpers ------------------------------ #

def _round_up(x, m):
    return (x + m - 1) // m * m


def _tpu_vmem_capacity_bytes():
    try:
        return int(pltpu.get_tpu_info().vmem_capacity_bytes)
    except Exception:
        return _DEFAULT_VMEM


@functools.lru_cache(maxsize=None)
def _single_buffered_weights_ok():
    """Probe once whether this jax build accepts pipeline_mode=pl.Buffered(1) on a BlockSpec."""
    def _copy_kernel(x_ref, o_ref):
        o_ref[...] = x_ref[...]

    try:
        spec = pl.BlockSpec((8, _LANE), lambda i: (0, 0), pipeline_mode=pl.Buffered(1))
        x = jnp.zeros((8, _LANE), jnp.float32)
        jax.block_until_ready(
            pl.pallas_call(
                _copy_kernel,
                out_shape=jax.ShapeDtypeStruct((8, _LANE), jnp.float32),
                grid=(2,),
                in_specs=[spec],
                out_specs=pl.BlockSpec((8, _LANE), lambda i: (0, 0)),
            )(x))
        return True
    except Exception:
        return False


def _resident_spec(shape, index_map):
    """BlockSpec for grid-invariant operands (weights / biases): single-buffer them when
    supported — their block index never changes, so double-buffering only wastes VMEM."""
    if _single_buffered_weights_ok():
        return pl.BlockSpec(shape, index_map, pipeline_mode=pl.Buffered(1))
    return pl.BlockSpec(shape, index_map)


# ----------------------------- Pallas kernels ------------------------------ #

def _gin_layer_kernel(a_ref, xk_ref, w1_ref, b1_ref, w2_ref, b2_ref, o_ref, acc_ref):
    """One fused GINConv layer on a row tile: MLP((A + I) @ x), eps = 0 folded into A.

    Grid = (row tiles [parallel], K tiles of A' [arbitrary]); acc_ref is the f32 aggregation
    accumulator; the block-diagonal 2-layer update MLP runs only on the last K step.
    """
    kb = pl.program_id(1)

    @pl.when(kb == 0)
    def _init():
        acc_ref[...] = jnp.zeros_like(acc_ref)

    # bf16 A' tile x bf16 activation K-slab -> f32 accumulate (MXU).
    acc_ref[...] += jnp.dot(a_ref[...], xk_ref[...], preferred_element_type=jnp.float32)

    @pl.when(kb == pl.num_programs(1) - 1)
    def _finalize():
        h = jnp.dot(acc_ref[...].astype(jnp.bfloat16), w1_ref[...],
                    preferred_element_type=jnp.float32) + b1_ref[...]
        h = jnp.maximum(h, 0.0)
        y = jnp.dot(h.astype(jnp.bfloat16), w2_ref[...],
                    preferred_element_type=jnp.float32) + b2_ref[...]
        o_ref[...] = y.astype(o_ref.dtype)          # bf16 chained to the next layer


def _mlp_kernel(x_ref, *refs, n_layers):
    """Plain MLP on a row tile (the rho net; the +-x combine is folded into its first weight)."""
    o_ref = refs[2 * n_layers]
    z = x_ref[...]
    for i in range(n_layers):
        w = refs[2 * i][...]
        b = refs[2 * i + 1][...]
        z = jnp.dot(z.astype(jnp.bfloat16), w, preferred_element_type=jnp.float32) + b
        if i < n_layers - 1:
            z = jnp.maximum(z, 0.0)
    o_ref[...] = z.astype(o_ref.dtype)


# ------------------------- tile / VMEM budget selection ---------------------- #

def _row_tile_candidates(n_pad, vmem_cap):
    big = vmem_cap >= 100 * 1024 * 1024            # 128-MiB v5e/v6e vs 64-MiB v7x
    tms = (512, 256, 128, 64, 32, 16, 8) if big else (256, 128, 64, 32, 16, 8)
    tks = (1024, 512, 256, 128) if big else (512, 256, 128)
    tm_c = [t for t in tms if t <= n_pad and n_pad % t == 0] or [n_pad]
    tk_c = [t for t in tks if t <= n_pad and n_pad % t == 0] or [n_pad]
    # Prefer >= 2 row tiles so the "parallel" axis can shard across TensorCores (v7x megacore).
    tm_pref = [t for t in tm_c if n_pad // t >= 2] or tm_c
    return tm_pref, tk_c


def _select_gin_tiles(n_pad, f_in, f_mid, f_out, weight_bytes, vmem_budget, vmem_cap):
    tm_c, tk_c = _row_tile_candidates(n_pad, vmem_cap)

    def fits(tm, tk):
        a_bytes = 2 * tm * tk * 2                  # double-buffered bf16 A' tile
        x_bytes = 2 * tk * f_in * 2                # double-buffered bf16 activation K-slab
        acc_bytes = tm * f_in * 4                  # f32 aggregation accumulator (scratch)
        out_bytes = 2 * tm * f_out * 2             # double-buffered bf16 output tile
        mid_bytes = tm * (f_in + f_mid + f_out) * 6  # rough MLP transients
        return (a_bytes + x_bytes + acc_bytes + out_bytes + mid_bytes
                + weight_bytes) <= vmem_budget

    for tm in tm_c:
        for tk in tk_c:
            if fits(tm, tk):
                return tm, tk
    return tm_c[-1], tk_c[-1]


def _select_row_tile(n_pad, per_row_bytes, weight_bytes, vmem_budget, vmem_cap):
    tm_c, _ = _row_tile_candidates(n_pad, vmem_cap)
    for tm in tm_c:
        if tm * per_row_bytes + weight_bytes <= vmem_budget:
            return tm
    return tm_c[-1]


# ------------------------------ Pallas wrappers ----------------------------- #

def gin_layer(a_prime, x_flat, w1, b1, w2, b2, *, tm, tk, vmem_limit):
    """Fused GINConv layer on flattened bf16 features: [N, F_in] -> [N, F_out] (bf16 out)."""
    n, f_in = x_flat.shape
    f_out = w2.shape[1]
    grid = (n // tm, n // tk)
    in_specs = [
        pl.BlockSpec((tm, tk), lambda i, j: (i, j)),      # A' = A + I tile (bf16)
        pl.BlockSpec((tk, f_in), lambda i, j: (j, 0)),    # activation K-slab (bf16)
        _resident_spec(w1.shape, lambda i, j: (0, 0)),    # block-diag W1 (bf16, single-buffered)
        _resident_spec(b1.shape, lambda i, j: (0, 0)),    # tiled bias 1 (f32)
        _resident_spec(w2.shape, lambda i, j: (0, 0)),    # block-diag W2 (bf16)
        _resident_spec(b2.shape, lambda i, j: (0, 0)),    # tiled bias 2 (f32)
    ]
    return pl.pallas_call(
        _gin_layer_kernel,
        out_shape=jax.ShapeDtypeStruct((n, f_out), jnp.bfloat16),
        grid=grid,
        in_specs=in_specs,
        out_specs=pl.BlockSpec((tm, f_out), lambda i, j: (i, 0)),
        scratch_shapes=[pltpu.VMEM((tm, f_in), jnp.float32)],
        compiler_params=pltpu.CompilerParams(
            dimension_semantics=("parallel", "arbitrary"),
            vmem_limit_bytes=vmem_limit),
    )(a_prime, x_flat, w1, b1, w2, b2)


def rho_mlp(enc_flat, rho_params, *, tm, vmem_limit):
    """One pallas_call for the whole rho MLP (the enc(x)+enc(-x) combine is folded into W1)."""
    n, width = enc_flat.shape
    n_layers = len(rho_params)
    k_out = rho_params[-1][0].shape[1]

    flat_params = []
    in_specs = [pl.BlockSpec((tm, width), lambda i: (i, 0))]
    for w, b in rho_params:
        flat_params += [w, b]
        in_specs.append(_resident_spec(w.shape, lambda i: (0, 0)))
        in_specs.append(_resident_spec(b.shape, lambda i: (0, 0)))

    return pl.pallas_call(
        functools.partial(_mlp_kernel, n_layers=n_layers),
        out_shape=jax.ShapeDtypeStruct((n, k_out), jnp.float32),
        grid=(n // tm,),
        in_specs=in_specs,
        out_specs=pl.BlockSpec((tm, k_out), lambda i: (i, 0)),
        compiler_params=pltpu.CompilerParams(
            dimension_semantics=("parallel",),
            vmem_limit_bytes=vmem_limit),
    )(enc_flat, *flat_params)


# ----------------------------- parameter preparation ------------------------ #

def prepare_params(gin_params, rho_params, k):
    """Build bf16 block-diagonal GIN weights kron(I_2k, W) + tiled f32 biases, fold the
    enc(x)+enc(-x) combine into the first rho weight, and zero-pad the last GIN / last rho
    layers up to 128-lane-dense outputs. Done once, outside the forward."""
    kk = 2 * k
    eye_kk = jnp.eye(kk, dtype=jnp.float32)

    out_ch = gin_params[-1][2].shape[1]
    enc_width = kk * out_ch                         # real encoder output lane count
    enc_width_pad = _round_up(enc_width, _LANE)     # lane-dense last-layer store / rho input

    gin_prepped = []
    n_gin = len(gin_params)
    for li, (w1, b1, w2, b2) in enumerate(gin_params):
        w1bd = jnp.kron(eye_kk, w1)
        b1t = jnp.tile(b1, (1, kk))
        w2bd = jnp.kron(eye_kk, w2)
        b2t = jnp.tile(b2, (1, kk))
        if li == n_gin - 1:
            w2bd = jnp.pad(w2bd, ((0, 0), (0, enc_width_pad - enc_width)))
            b2t = jnp.pad(b2t, ((0, 0), (0, enc_width_pad - enc_width)))
        gin_prepped.append((w1bd.astype(jnp.bfloat16), b1t.astype(jnp.float32),
                            w2bd.astype(jnp.bfloat16), b2t.astype(jnp.float32)))

    rho_prepped = []
    n_rho = len(rho_params)
    for li, (w, b) in enumerate(rho_params):
        if li == 0:
            # rho(z+ + z-) = [W1; W1] applied to the concatenated [z+, z-] lanes (sign fold).
            assert w.shape[0] == k * out_ch, \
                "rho input dim must equal k * out_channels (out_channels == 2 in GINDeepSigns)"
            w = jnp.concatenate([w, w], axis=0)                     # [kk*out_ch, hidden]
            w = jnp.pad(w, ((0, enc_width_pad - enc_width), (0, 0)))
        if li == n_rho - 1:
            k_pad = _round_up(w.shape[1], _LANE)                    # lane-dense final store
            w = jnp.pad(w, ((0, 0), (0, k_pad - w.shape[1])))
            b = jnp.pad(b, ((0, 0), (0, k_pad - b.shape[1])))
        rho_prepped.append((w.astype(jnp.bfloat16), b.astype(jnp.float32)))

    return gin_prepped, rho_prepped


# ----------------------------- Model (glue in JAX) -------------------------- #

def gin_deepsigns_forward(a, x3d, gin_prepped, rho_prepped, *, k):
    """f(v1..vk) = rho(enc(v1)+enc(-v1), ..., enc(vk)+enc(-vk)), eval mode (no BN/dropout)."""
    n, kdim, c_in = x3d.shape
    assert kdim == k
    kk = 2 * k
    n_pad = _round_up(max(n, _LANE), _LANE)

    vmem_cap = _tpu_vmem_capacity_bytes()
    vmem_limit = int(vmem_cap * 0.75)     # ~96 MiB on 128-MiB v5e/v6e, ~48 MiB on 64-MiB v7x

    # A' = A + I (eps = 0 self term folded in), zero row/col padded, bf16 (small ints: exact).
    a_prime = jnp.pad(a, ((0, n_pad - n), (0, n_pad - n)))
    a_prime = (a_prime + jnp.eye(n_pad, dtype=a.dtype)).astype(jnp.bfloat16)

    # Fused +x / -x encoder pass: stack along the eigenvector axis (kk = 2k virtual
    # eigenvectors), flatten to lanes, pad rows, chain activations in bf16.
    h = jnp.concatenate([x3d, -x3d], axis=1).reshape(n, kk * c_in)
    h = jnp.pad(h, ((0, n_pad - n), (0, 0))).astype(jnp.bfloat16)

    single_buf = _single_buffered_weights_ok()
    for (w1, b1, w2, b2) in gin_prepped:
        weight_bytes = (w1.size + w2.size) * 2 + (b1.size + b2.size) * 4
        if not single_buf:
            weight_bytes *= 2
        tm, tk = _select_gin_tiles(n_pad, h.shape[1], w1.shape[1], w2.shape[1],
                                   weight_bytes, vmem_limit, vmem_cap)
        h = gin_layer(a_prime, h, w1, b1, w2, b2, tm=tm, tk=tk, vmem_limit=vmem_limit)

    # rho (whole MLP in one pallas_call); the +-x combine is already folded into its W1.
    rho_weight_bytes = sum(w.size * 2 + b.size * 4 for w, b in rho_prepped)
    per_row_bytes = (4 * h.shape[1] + 8 * rho_prepped[-1][0].shape[1]
                     + 8 * sum(w.shape[1] for w, _ in rho_prepped))
    tm = _select_row_tile(n_pad, per_row_bytes, rho_weight_bytes, vmem_limit, vmem_cap)
    y = rho_mlp(h, rho_prepped, tm=tm, vmem_limit=vmem_limit)     # [n_pad, k_pad] f32

    return y[:n, :k].reshape(n, k, 1)


# --------------------------- pure-JAX f32 reference -------------------------- #

def reference_forward(a, x3d, gin_params, rho_params):
    n = x3d.shape[0]

    def gin_enc(x):
        h = x
        for (w1, b1, w2, b2) in gin_params:
            agg = h + jnp.einsum('ij,jkc->ikc', a, h)             # (1 + eps) x + A x, eps = 0
            h = jnp.maximum(jnp.einsum('nkc,cd->nkd', agg, w1) + b1, 0.0)
            h = jnp.einsum('nkc,cd->nkd', h, w2) + b2
        return h

    z = gin_enc(x3d) + gin_enc(-x3d)
    z = z.reshape(n, -1)
    for i, (w, b) in enumerate(rho_params):
        z = z @ w + b
        if i < len(rho_params) - 1:
            z = jnp.maximum(z, 0.0)
    return z.reshape(n, -1, 1)


# ------------------------------ Parameter init ------------------------------ #

def init_linear(key, fan_in, fan_out):
    """Deterministic init mimicking torch.nn.Linear's uniform(-1/sqrt(fan_in), +)."""
    k1, k2 = jax.random.split(key)
    bound = 1.0 / (fan_in ** 0.5)
    w = jax.random.uniform(k1, (fan_in, fan_out), jnp.float32, -bound, bound)
    b = jax.random.uniform(k2, (1, fan_out), jnp.float32, -bound, bound)
    return w, b


def init_gin_deepsigns(key, in_channels, hidden_channels, out_channels, num_layers, k):
    gin_dims = [(in_channels, hidden_channels, hidden_channels)]
    gin_dims += [(hidden_channels, hidden_channels, hidden_channels)] * (num_layers - 2)
    gin_dims += [(hidden_channels, hidden_channels, out_channels)]

    gin_params = []
    for (ci, ch, co) in gin_dims:
        key, k1, k2 = jax.random.split(key, 3)
        w1, b1 = init_linear(k1, ci, ch)
        w2, b2 = init_linear(k2, ch, co)
        gin_params.append((w1, b1, w2, b2))

    rho_dim = 2 * k
    if num_layers == 1:
        rho_dims = [(rho_dim, k)]
    else:
        rho_dims = [(rho_dim, hidden_channels)]
        rho_dims += [(hidden_channels, hidden_channels)] * (num_layers - 2)
        rho_dims += [(hidden_channels, k)]

    rho_params = []
    for (ci, co) in rho_dims:
        key, k1 = jax.random.split(key)
        rho_params.append(init_linear(k1, ci, co))

    return gin_params, rho_params


# ----------------------------------- Main ----------------------------------- #

if __name__ == "__main__":
    key = jax.random.PRNGKey(0)

    # Small shapes consistent with GINDeepSigns (rho input 2*k requires out_channels == 2).
    N = 16
    k = 8
    in_channels = 4
    hidden_channels = 32
    out_channels = 2
    num_layers = 3

    key, kx = jax.random.split(key)
    x = jax.random.normal(kx, (N, k, in_channels), dtype=jnp.float32)

    # Deterministic graph: bidirectional ring over N nodes. edge_index: [2, E]
    src = jnp.arange(N, dtype=jnp.int32)
    dst = (src + 1) % N
    edge_index = jnp.concatenate(
        [jnp.stack([src, dst]), jnp.stack([dst, src])], axis=1)

    # Dense adjacency for aggregation: A[i, j] = #edges (j -> i)
    A = jnp.zeros((N, N), dtype=jnp.float32).at[edge_index[1], edge_index[0]].add(1.0)

    gin_params, rho_params = init_gin_deepsigns(
        key, in_channels, hidden_channels, out_channels, num_layers, k)
    gin_prepped, rho_prepped = prepare_params(gin_params, rho_params, k=k)

    out = jax.block_until_ready(gin_deepsigns_forward(A, x, gin_prepped, rho_prepped, k=k))
    assert out.shape == (N, k, 1), out.shape
    assert out.dtype == jnp.float32

    # Sign invariance: flipping the eigenvectors' sign must not change the output.
    out_neg = jax.block_until_ready(gin_deepsigns_forward(A, -x, gin_prepped, rho_prepped, k=k))
    assert jnp.allclose(out, out_neg, atol=1e-5)

    # Loose-tolerance check against a pure-JAX f32 reference (bf16 MXU inputs with f32
    # accumulation are an intentional precision choice).
    ref = reference_forward(A, x, gin_params, rho_params)
    assert jnp.allclose(out, ref, atol=1e-1, rtol=1e-1), float(jnp.max(jnp.abs(out - ref)))

    print("KERNEL_OK")
</pallas_src>

<mosaic_0001>
module attributes {stable_mosaic.version = 11 : i64} {
  func.func @_copy_kernel(%arg0: i32, %arg1: memref<8x128xf32, #tpu.memory_space<vmem>>, %arg2: memref<8x128xf32, #tpu.memory_space<vmem>>) attributes {dimension_semantics = [#tpu.dimension_semantics<arbitrary>], iteration_bounds = array<i64: 2>, scalar_prefetch = 0 : i64, scratch_operands = 0 : i64, tpu.core_type = #tpu.core_type<tc>, window_params = [{pipeline_mode = #tpu.pipeline_mode<synchronous>, transform_indices = @transform_0, window_bounds = array<i64: 8, 128>}, {pipeline_mode = #tpu.pipeline_mode<synchronous>, transform_indices = @transform_1, window_bounds = array<i64: 8, 128>}]} {
    %c0 = arith.constant 0 : index
    %c0_0 = arith.constant 0 : index
    %0 = vector.load %arg1[%c0, %c0_0] : memref<8x128xf32, #tpu.memory_space<vmem>>, vector<8x128xf32>
    %c0_1 = arith.constant 0 : index
    %c0_2 = arith.constant 0 : index
    %1 = vector.load %arg2[%c0_1, %c0_2] : memref<8x128xf32, #tpu.memory_space<vmem>>, vector<8x128xf32>
    tpu.vector_store %arg2[%c0_1, %c0_2], %0 {strides = array<i32>} : memref<8x128xf32, #tpu.memory_space<vmem>>, vector<8x128xf32>,
    return
  }
  func.func @transform_0(%arg0: i32) -> (i32, i32) {
    %c0_i32 = arith.constant 0 : i32
    %c0_i32_0 = arith.constant 0 : i32
    %c0_i32_1 = arith.constant 0 : i32
    return %c0_i32, %c0_i32_0 : i32, i32
  }
  func.func @transform_1(%arg0: i32) -> (i32, i32) {
    %c0_i32 = arith.constant 0 : i32
    %c0_i32_0 = arith.constant 0 : i32
    %c0_i32_1 = arith.constant 0 : i32
    return %c0_i32, %c0_i32_0 : i32, i32
  }
}

module attributes {stable_mosaic.version = 11 : i64} {
  func.func @_gin_layer_kernel(%arg0: i32, %arg1: i32, %arg2: memref<64x128xbf16, #tpu.memory_space<vmem>>, %arg3: memref<128x64xbf16, #tpu.memory_space<vmem>>, %arg4: memref<64x512xbf16, #tpu.memory_space<vmem>>, %arg5: memref<1x512xf32, #tpu.memory_space<vmem>>, %arg6: memref<512x512xbf16, #tpu.memory_space<vmem>>, %arg7: memref<1x512xf32, #tpu.memory_space<vmem>>, %arg8: memref<64x512xbf16, #tpu.memory_space<vmem>>, %arg9: memref<64x64xf32, #tpu.memory_space<vmem>>) attributes {dimension_semantics = [#tpu.dimension_semantics<parallel>, #tpu.dimension_semantics<arbitrary>], iteration_bounds = array<i64: 2, 1>, scalar_prefetch = 0 : i64, scratch_operands = 1 : i64, tpu.core_type = #tpu.core_type<tc>, window_params = [{transform_indices = @transform_0, window_bounds = array<i64: 64, 128>}, {transform_indices = @transform_1, window_bounds = array<i64: 128, 64>}, {pipeline_mode = #tpu.pipeline_mode<synchronous>, transform_indices = @transform_2, window_bounds = array<i64: 64, 512>}, {pipeline_mode = #tpu.pipeline_mode<synchronous>, transform_indices = @transform_3, window_bounds = array<i64: 1, 512>}, {pipeline_mode = #tpu.pipeline_mode<synchronous>, transform_indices = @transform_4, window_bounds = array<i64: 512, 512>}, {pipeline_mode = #tpu.pipeline_mode<synchronous>, transform_indices = @transform_5, window_bounds = array<i64: 1, 512>}, {transform_indices = @transform_6, window_bounds = array<i64: 64, 512>}]} {
    %c0_i32 = arith.constant 0 : i32
    %0 = arith.cmpi eq, %arg1, %c0_i32 : i32
    %1 = arith.extui %0 : i1 to i32
    %c0_i32_0 = arith.constant 0 : i32
    %2 = arith.cmpi ne, %1, %c0_i32_0 : i32
    scf.if %2 {
      %cst_10 = arith.constant 0.000000e+00 : f32
      %12 = vector.broadcast %cst_10 : f32 to vector<64x64xf32>
      %c0_11 = arith.constant 0 : index
      %c0_12 = arith.constant 0 : index
      %13 = vector.load %arg9[%c0_11, %c0_12] : memref<64x64xf32, #tpu.memory_space<vmem>>, vector<64x64xf32>
      tpu.vector_store %arg9[%c0_11, %c0_12], %12 {strides = array<i32>} : memref<64x64xf32, #tpu.memory_space<vmem>>, vector<64x64xf32>,
    } else {
    }
    %c0 = arith.constant 0 : index
    %c0_1 = arith.constant 0 : index
    %3 = vector.load %arg9[%c0, %c0_1] : memref<64x64xf32, #tpu.memory_space<vmem>>, vector<64x64xf32>
    %c0_2 = arith.constant 0 : index
    %c0_3 = arith.constant 0 : index
    %4 = vector.load %arg2[%c0_2, %c0_3] : memref<64x128xbf16, #tpu.memory_space<vmem>>, vector<64x128xbf16>
    %c0_4 = arith.constant 0 : index
    %c0_5 = arith.constant 0 : index
    %5 = vector.load %arg3[%c0_4, %c0_5] : memref<128x64xbf16, #tpu.memory_space<vmem>>, vector<128x64xbf16>
    %cst = arith.constant dense<0.000000e+00> : vector<64x64xf32>
    %6 = tpu.matmul %4, %5, %cst {dimension_numbers = #tpu.dot_dimension_numbers<[1], [0], [0], [1], [0, 0, 1, 1], [], []>} : vector<64x128xbf16>, vector<128x64xbf16>, vector<64x64xf32> -> vector<64x64xf32>
    %7 = arith.addf %3, %6 : vector<64x64xf32>
    %c0_6 = arith.constant 0 : index
    %c0_7 = arith.constant 0 : index
    %8 = vector.load %arg9[%c0_6, %c0_7] : memref<64x64xf32, #tpu.memory_space<vmem>>, vector<64x64xf32>
    tpu.vector_store %arg9[%c0_6, %c0_7], %7 {strides = array<i32>} : memref<64x64xf32, #tpu.memory_space<vmem>>, vector<64x64xf32>,
    %c0_i32_8 = arith.constant 0 : i32
    %9 = arith.cmpi eq, %arg1, %c0_i32_8 : i32
    %10 = arith.extui %9 : i1 to i32
    %c0_i32_9 = arith.constant 0 : i32
    %11 = arith.cmpi ne, %10, %c0_i32_9 : i32
    scf.if %11 {
      %c0_10 = arith.constant 0 : index
      %c0_11 = arith.constant 0 : index
      %12 = vector.load %arg9[%c0_10, %c0_11] : memref<64x64xf32, #tpu.memory_space<vmem>>, vector<64x64xf32>
      %13 = arith.truncf %12 : vector<64x64xf32> to vector<64x64xbf16>
      %c0_12 = arith.constant 0 : index
      %c0_13 = arith.constant 0 : index
      %14 = vector.load %arg4[%c0_12, %c0_13] : memref<64x512xbf16, #tpu.memory_space<vmem>>, vector<64x512xbf16>
      %cst_14 = arith.constant dense<0.000000e+00> : vector<64x512xf32>
      %15 = tpu.matmul %13, %14, %cst_14 {dimension_numbers = #tpu.dot_dimension_numbers<[1], [0], [0], [1], [0, 0, 1, 1], [], []>} : vector<64x64xbf16>, vector<64x512xbf16>, vector<64x512xf32> -> vector<64x512xf32>
      %c0_15 = arith.constant 0 : index
      %c0_16 = arith.constant 0 : index
      %16 = vector.load %arg5[%c0_15, %c0_16] : memref<1x512xf32, #tpu.memory_space<vmem>>, vector<1x512xf32>
      %17 = vector.broadcast %16 : vector<1x512xf32> to vector<64x512xf32>
      %18 = arith.addf %15, %17 : vector<64x512xf32>
      %cst_17 = arith.constant 0.000000e+00 : f32
      %19 = vector.broadcast %cst_17 : f32 to vector<64x512xf32>
      %20 = arith.maximumf %18, %19 : vector<64x512xf32>
      %21 = arith.truncf %20 : vector<64x512xf32> to vector<64x512xbf16>
      %c0_18 = arith.constant 0 : index
      %c0_19 = arith.constant 0 : index
      %22 = vector.load %arg6[%c0_18, %c0_19] : memref<512x512xbf16, #tpu.memory_space<vmem>>, vector<512x512xbf16>
      %cst_20 = arith.constant dense<0.000000e+00> : vector<64x512xf32>
      %23 = tpu.matmul %21, %22, %cst_20 {dimension_numbers = #tpu.dot_dimension_numbers<[1], [0], [0], [1], [0, 0, 1, 1], [], []>} : vector<64x512xbf16>, vector<512x512xbf16>, vector<64x512xf32> -> vector<64x512xf32>
      %c0_21 = arith.constant 0 : index
      %c0_22 = arith.constant 0 : index
      %24 = vector.load %arg7[%c0_21, %c0_22] : memref<1x512xf32, #tpu.memory_space<vmem>>, vector<1x512xf32>
      %25 = vector.broadcast %24 : vector<1x512xf32> to vector<64x512xf32>
      %26 = arith.addf %23, %25 : vector<64x512xf32>
      %27 = arith.truncf %26 : vector<64x512xf32> to vector<64x512xbf16>
      %c0_23 = arith.constant 0 : index
      %c0_24 = arith.constant 0 : index
      %28 = vector.load %arg8[%c0_23, %c0_24] : memref<64x512xbf16, #tpu.memory_space<vmem>>, vector<64x512xbf16>
      tpu.vector_store %arg8[%c0_23, %c0_24], %27 {strides = array<i32>} : memref<64x512xbf16, #tpu.memory_space<vmem>>, vector<64x512xbf16>,
    } else {
    }
    return
  }
  func.func @transform_0(%arg0: i32, %arg1: i32) -> (i32, i32) {
    %c0_i32 = arith.constant 0 : i32
    return %arg0, %arg1 : i32, i32
  }
  func.func @transform_1(%arg0: i32, %arg1: i32) -> (i32, i32) {
    %c0_i32 = arith.constant 0 : i32
    %c0_i32_0 = arith.constant 0 : i32
    return %arg1, %c0_i32 : i32, i32
  }
  func.func @transform_2(%arg0: i32, %arg1: i32) -> (i32, i32) {
    %c0_i32 = arith.constant 0 : i32
    %c0_i32_0 = arith.constant 0 : i32
    %c0_i32_1 = arith.constant 0 : i32
    return %c0_i32, %c0_i32_0 : i32, i32
  }
  func.func @transform_3(%arg0: i32, %arg1: i32) -> (i32, i32) {
    %c0_i32 = arith.constant 0 : i32
    %c0_i32_0 = arith.constant 0 : i32
    %c0_i32_1 = arith.constant 0 : i32
    return %c0_i32, %c0_i32_0 : i32, i32
  }
  func.func @transform_4(%arg0: i32, %arg1: i32) -> (i32, i32) {
    %c0_i32 = arith.constant 0 : i32
    %c0_i32_0 = arith.constant 0 : i32
    %c0_i32_1 = arith.constant 0 : i32
    return %c0_i32, %c0_i32_0 : i32, i32
  }
  func.func @transform_5(%arg0: i32, %arg1: i32) -> (i32, i32) {
    %c0_i32 = arith.constant 0 : i32
    %c0_i32_0 = arith.constant 0 : i32
    %c0_i32_1 = arith.constant 0 : i32
    return %c0_i32, %c0_i32_0 : i32, i32
  }
  func.func @transform_6(%arg0: i32, %arg1: i32) -> (i32, i32) {
    %c0_i32 = arith.constant 0 : i32
    %c0_i32_0 = arith.constant 0 : i32
    return %arg0, %c0_i32 : i32, i32
  }
}

</mosaic_0001>

<bundles_post_ra>
// kernel: tpu_custom_call.1
= control target key start
LH: loop header
LB: loop body
LE: loop exit
PB: predicated region body
PF: predicated region fallthrough
CT: control target
= control target key end

     0   :  { %6 = vsyncpa [#allocation3], 0  ;;  %s286_s0 = inlined_call_operand.hbm [shape: f32[8,128], index: 0, kind: input, shape index: {}]   ;;  %s287_s1 = inlined_call_operand.hbm [shape: f32[8,128], index: 1, kind: output, shape index: {}]  }
   0x1   :  { %7 = vsyncpa [#allocation4], 0  ;;  %s269_s6 = smov 0  }
   0x2 LB: > { %s148_s7 = sadd.s32 4294967295, %s255_s6   ;;  %p149_p0 = scmp.ge.s32.totalorder %s255_s6, 1  ;;  %s255_s6 = sphi %s269_s6, %s13_s6  }
   0x3   : > { %p60_p1 = scmp.lt.s32.totalorder %s255_s6, 3  ;;  %s72_s10 = sshll.u32 %s286_s0, 4  ;;  %s73_s10 = int_to_ptr.hbm [resolvable:$true] %s72_s10 }
   0x4   : > { %p169_p3 = scmp.eq.s32.totalorder %s148_s7, 0  ;;  %s257_s11 = smov [#allocation2]  }
   0x5   : > { %p61_p2 = pnand %p149_p0, %p60_p1  ;;  %s74_s12 = sshll.u32 %s257_s11, 4  ;;  %s75_s12 = int_to_ptr.vmem [resolvable:$true] %s74_s12 }
   0x7   : > { %p165_p4 = pneg %p61_p2  ;;  %87 = sbr.rel (%p61_p2) target bundleno = 19 (0x13), region = 24 }
   0x9   : > { %p166_p5 = pnand %p169_p3, %p165_p4 }
   0xb   : > { %168 = dma.hbm_to_vmem [thread:$0]  (!%p166_p5), %s73_s10, 128, %s75_s12, [#allocation3]  }
   0xc   : > { %246 = dma.done.wait (%p169_p3), [#allocation3], 128  }
   0xd   : > { %248 = vsyncadd (%p169_p3), [#allocation3], 4294967168  ;;  %s258_s13 = smov [#allocation5]   ;;  %s108_s17 = sshll.u32 %s287_s1, 4  ;;  %v98_v0 = vld [vmem:[#allocation2] sm:$0xff]  ;;  %s109_s17 = int_to_ptr.hbm [resolvable:$true] %s108_s17 }
   0xe   : > { %s106_s14 = sshll.u32 %s258_s13, 4  ;;  %p171_p6 = scmp.eq.s32.totalorder %s148_s7, 1  ;;  %99 = vst [vmem:[#allocation5] sm:$0xff] %v98_v0  ;;  %s107_s14 = int_to_ptr.vmem [resolvable:$true] %s106_s14 }
  0x10   : > { %162 = dma.vmem_to_hbm [thread:$0]  (%p171_p6), %s107_s14, 128, %s109_s17, [#allocation4]  }
  0x11   : > { %250 = dma.done.wait (%p171_p6), [#allocation4], 128  }
  0x12   : > { %252 = vsyncadd (%p171_p6), [#allocation4], 4294967168 }
  0x13 PF: > { %s13_s6 = sadd.s32 1, %s255_s6  }
  0x14   : > { %p10_p7 = scmp.ge.s32.totalorder %s13_s6, 4  }
  0x16   :  { %12 = sbr.rel (!%p10_p7) target bundleno = 2 (0x2), region = 53 }
  0x1b   :  { %122 = vsyncpa [#allocation3], 1 }
  0x1c   :  { %124 = vsyncpa [#allocation3 + $0x1], 1 }
  0x1d   :  { %125 = vsyncpa [#allocation4], 1 }
  0x1e   :  { %127 = vsyncpa [#allocation4 + $0x1], 1 }

// kernel: tpu_custom_call.1
= control target key start
LH: loop header
LB: loop body
LE: loop exit
PB: predicated region body
PF: predicated region fallthrough
CT: control target
= control target key end

     0   :  { %11 = vsyncpa [#allocation4], 0  ;;  %s3801_s0 = inlined_call_operand.vmem [shape: bf16[128,128], index: 0, kind: input, shape index: {}]   ;;  %s3802_s1 = inlined_call_operand.vmem [shape: bf16[128,64], index: 1, kind: input, shape index: {}]   ;;  %s3803_s2 = inlined_call_operand.hbm [shape: bf16[64,512], index: 2, kind: input, shape index: {}]   ;;  %s3804_s3 = inlined_call_operand.vmem [shape: f32[1,512], index: 3, kind: input, shape index: {}]   ;;  %s3805_s4 = inlined_call_operand.hbm [shape: bf16[512,512], index: 4, kind: input, shape index: {}]   ;;  %s3806_s5 = inlined_call_operand.vmem [shape: f32[1,512], index: 5, kind: input, shape index: {}]   ;;  %s3807_s6 = inlined_call_operand.hbm [shape: bf16[128,512], index: 6, kind: output, shape index: {}]  }
   0x1   :  { %12 = vsyncpa [#allocation7], 0 }
   0x2   :  { %13 = vsyncpa [#allocation5], 0 }
   0x3   :  { %15 = vsyncpa [#allocation5 + $0x1], 0  ;;  %s3290_s21 = smov 0   ;;  %s3292_s22 = smov 0  }
   0x4   :  { %s3294_s23 = smov 0   ;;  %s3296_s24 = smov 0  }
   0x5   :  { %s3298_s25 = smov 0   ;;  %s3300_s26 = smov 0  }
   0x6 LB: > { %s2194_s27 = sadd.s32 4294967295, %s3246_s26   ;;  %s2195_s28 = sadd.s32 4294967294, %s3246_s26   ;;  %s3246_s26 = sphi %s3300_s26, %s21_s26   ;;  %s3242_s25 = sphi %s3298_s25, %s3816_s25   ;;  %s3238_s24 = sphi %s3296_s24, %s3815_s24   ;;  %s3234_s23 = sphi %s3294_s23, %s3814_s23   ;;  %s3230_s22 = sphi %s3292_s22, %s3813_s22   ;;  %s3226_s21 = sphi %s3290_s21, %s3812_s21  }
   0x7   : > { %s33_s29 = sadd.s32 1, %s3242_s25  ;;  %s178_s30 = sadd.s32 1, %s3234_s23 }
   0x8   : > { %p35_p0 = scmp.ge.s32.totalorder %s33_s29, 2  ;;  %p188_p1 = scmp.ne.s32.totalorder %s3234_s23, %s3230_s22 }
   0x9   : > { %p189_p2 = scmp.eq.s32.totalorder %s2194_s27, 1  ;;  %p194_p3 = scmp.ne.s32.totalorder %s3230_s22, %s3226_s21 }
   0xa   : > { %s3818_s29 = smov (%p35_p0, %s33_s29), 0  ;;  %p195_p5 = scmp.eq.s32.totalorder %s2195_s28, 1 }
   0xb   : > { %p3330_p4 = por %p189_p2, %p188_p1  ;;  %s175_s8 = ssub.s32 %s3242_s25, %s3818_s29 }
   0xc   : > { %p2196_p6 = scmp.ge.s32.totalorder %s3246_s26, 1  ;;  %p176_p7 = scmp.eq.s32.totalorder %s175_s8, 0 }
   0xd   : > { %p3337_p8 = por %p195_p5, %p194_p3  ;;  %p202_p9 = scmp.lt.s32.totalorder %s3246_s26, 3 }
   0xe   : > { %s3343_s10 = scalar_select %p176_p7, %s3234_s23, %s178_s30  }
   0xf   : > { %p3345_p10 = pnand %p2196_p6, %p202_p9  ;;  %p3349_p11 = scmp.eq.s32.totalorder %s2194_s27, 0 }
  0x10   : > { %s222_s15 = sshll.u32 %s3803_s2, 4  ;;  %s3248_s16 = smov [#allocation3]   ;;  %s223_s15 = int_to_ptr.hbm [resolvable:$true] %s222_s15 }
  0x11   : > { %p3029_p12 = pneg %p3345_p10  ;;  %s224_s17 = sshll.u32 %s3248_s16, 4  ;;  %s225_s17 = int_to_ptr.vmem [resolvable:$true] %s224_s17 }
  0x12   : > { %s239_s20 = sshll.u32 %s3805_s4, 4  ;;  %s3249_s27 = smov 256   ;;  %s240_s20 = int_to_ptr.hbm [resolvable:$true] %s239_s20 }
  0x13   : > { %p3030_p13 = pnand %p3349_p11, %p3029_p12  ;;  %s3250_s28 = smov 16  }
  0x14   : > { %s3251_s30 = smov [#allocation6]   ;;  %272 = sbr.rel (%p3345_p10) target bundleno = 800 (0x320), region = 44 }
  0x15   : > { %3032 = dma.hbm_to_vmem [thread:$0]  (!%p3030_p13), %s223_s15, 2048, %s225_s17, [#allocation4], %s3249_s27, %s3249_s27, %s3250_s28  }
  0x16   : > { %s241_s8 = sshll.u32 %s3251_s30, 4  ;;  %s242_s8 = int_to_ptr.vmem [resolvable:$true] %s241_s8 }
  0x17   : > { %3035 = dma.hbm_to_vmem [thread:$0]  (!%p3030_p13), %s240_s20, 16384, %s242_s8, [#allocation7], %s3249_s27, %s3249_s27, %s3250_s28  }
  0x19   : > { %3213 = dma.done.wait (%p3349_p11), [#allocation4], 2048  }
  0x1a   : > { %3215 = vsyncadd (%p3349_p11), [#allocation4], 4294965248 }
  0x1b   : > { %3217 = dma.done.wait (%p3349_p11), [#allocation7], 16384  }
  0x1c   : > { %3219 = vsyncadd (%p3349_p11), [#allocation7], 4294950912  ;;  %v2864_v0 = vld [vmem:[%s3802_s1 + $0x38] sm:$0xff]  ;;  %v2863_v1 = vld [vmem:[%s3802_s1 + $0x30] sm:$0xff]  ;;  %s2205_s12 = sshll.u32 %s3238_s24, 3  ;;  %vm337_vm0 = vcmask 523264  }
  0x1d   : > { %450 = vmatpush.bf16.msra.mxu0 %v2864_v0  ;;  %v2862_v2 = vld [vmem:[%s3802_s1 + $0x28] sm:$0xff]  ;;  %v2861_v3 = vld [vmem:[%s3802_s1 + $0x20] sm:$0xff]  ;;  %v2860_v4 = vld [vmem:[%s3802_s1 + $0x18] sm:$0xff]  ;;  %p317_p0 = scmp.lt.s32.totalorder %s2205_s12, 15  ;;  %v3252_v10 = vmov 0.0   ;;  %s313_s28 = sand.u32 1, %s3230_s22  }
  0x1e   : > { %v2859_v5 = vld [vmem:[%s3802_s1 + $0x10] sm:$0xff]  ;;  %v2858_v6 = vld [vmem:[%s3802_s1 + $0x8] sm:$0xff]  ;;  %v2857_v7 = vld [vmem:[%s3802_s1] sm:$0xff]  ;;  %338 = vst.msk [vmem:[#allocation2] sm:$0xff] %vm337_vm0, %v3252_v10  ;;  %s2204_s30 = sshll.u32 %s313_s28, 7  ;;  %s3010_s13 = sshll.u32 %s3238_s24, 7 }
  0x1f   : > { %s3820_s12 = smov (!%p317_p0, %s2205_s12), 15  ;;  %339 = vst.msk [vmem:[#allocation2 + $0x8] sm:$0xff] %vm337_vm0, %v3252_v10  ;;  %v2305_v13 = vld [vmem:[#allocation3 + $0x60] sm:$0xf]  ;;  %v2879_v14 = vld [vmem:[#allocation3 + $0x6c] sm:$0xf0]  ;;  %s2080_s15 = scalar_lea.hbm %s3807_s6, %s3010_s13 }
  0x20   : > { %s2206_s14 = sshll.u32 %s3820_s12, 2  ;;  %340 = vst.msk [vmem:[#allocation2 + $0x10] sm:$0xff] %vm337_vm0, %v3252_v10  ;;  %v2306_v15 = vor.u32 %v2879_v14, %v2305_v13  ;;  %v2289_v16 = vld [vmem:[#allocation3 + $0x40] sm:$0xf]  ;;  %v2875_v17 = vld [vmem:[#allocation3 + $0x4c] sm:$0xf0] }
  0x21   : > { %451 = vmatpush.bf16.msra.mxu0 %v2863_v1  ;;  %s323_s18 = scalar_lea.vmem %s3801_s0, %s2206_s14  ;;  %341 = vst.msk [vmem:[#allocation2 + $0x18] sm:$0xff] %vm337_vm0, %v3252_v10  ;;  %v2290_v18 = vor.u32 %v2875_v17, %v2289_v16  ;;  %v2273_v19 = vld [vmem:[#allocation3 + $0x20] sm:$0xf]  ;;  %v2871_v20 = vld [vmem:[#allocation3 + $0x2c] sm:$0xf0]  ;;  %s3680_s8 = scalar_lea.vmem [#allocation8], %s2204_s30 }
  0x22   : > { %v2853_v8 = vld [vmem:[%s323_s18] sm:$0xff]  ;;  %v2854_v9 = vld [vmem:[%s323_s18 + $0x8] sm:$0xff]  ;;  %342 = vst.msk [vmem:[#allocation2 + $0x20] sm:$0xff] %vm337_vm0, %v3252_v10  ;;  %v2855_v11 = vld [vmem:[%s323_s18 + $0x10] sm:$0xff]  ;;  %633 = vmatpush.bf16.msra.mxu1 %v2306_v15  ;;  %3011 = vmatpush.bf16.msra.mxu2 %v2306_v15  ;;  %v2274_v21 = vor.u32 %v2871_v20, %v2273_v19  ;;  %s2081_s16 = sshll.u32 %s3680_s8, 4  ;;  %s2083_s17 = sshll.u32 %s2080_s15, 4  ;;  %s2082_s16 = int_to_ptr.vmem [resolvable:$true] %s2081_s16  ;;  %s2084_s17 = int_to_ptr.hbm [resolvable:$true] %s2083_s17 }
  0x23   : > { %343 = vst.msk [vmem:[#allocation2 + $0x28] sm:$0xff] %vm337_vm0, %v3252_v10  ;;  %v2856_v12 = vld [vmem:[%s323_s18 + $0x18] sm:$0xff]  ;;  %3012 = vmatpush.bf16.msra.mxu3 %v2306_v15  ;;  %v2257_v22 = vld [vmem:[#allocation3] sm:$0xf]  ;;  %v2867_v23 = vld [vmem:[#allocation3 + $0xc] sm:$0xf0] }
  0x24   : > { %344 = vst.msk [vmem:[#allocation2 + $0x30] sm:$0xff] %vm337_vm0, %v3252_v10  ;;  %v2258_v24 = vor.u32 %v2867_v23, %v2257_v22  ;;  %v2878_v25 = vld [vmem:[#allocation3 + $0x6c] sm:$0xf]  ;;  %v2315_v26 = vld [vmem:[#allocation3 + $0x78] sm:$0xf0]  ;;  %s2068_s24 = scalar_lea.sflag [#allocation5], %s313_s28 }
  0x25   : > { %452 = vmatpush.bf16.msra.mxu0 %v2862_v2  ;;  %345 = vst.msk [vmem:[#allocation2 + $0x38] sm:$0xff] %vm337_vm0, %v3252_v10  ;;  %v2318_v27 = vor.u32 %v2878_v25, %v2315_v26  ;;  %v2874_v28 = vld [vmem:[#allocation3 + $0x4c] sm:$0xf]  ;;  %v2299_v29 = vld [vmem:[#allocation3 + $0x58] sm:$0xf0]  ;;  %v346_v34 = vld [vmem:[#allocation2] sm:$0xff] }
  0x26   : > { %634 = vmatpush.bf16.msra.mxu1 %v2290_v18  ;;  %3013 = vmatpush.bf16.msra.mxu2 %v2290_v18  ;;  %v2302_v30 = vor.u32 %v2874_v28, %v2299_v29  ;;  %v2870_v31 = vld [vmem:[#allocation3 + $0x2c] sm:$0xf]  ;;  %v2283_v32 = vld [vmem:[#allocation3 + $0x38] sm:$0xf0]  ;;  %v2877_v43 = vld [vmem:[#allocation3 + $0x64] sm:$0xf] }
  0x27   : > { %3014 = vmatpush.bf16.msra.mxu3 %v2290_v18  ;;  %v2286_v33 = vor.u32 %v2870_v31, %v2283_v32  ;;  %v2866_v35 = vld [vmem:[#allocation3 + $0xc] sm:$0xf]  ;;  %v2267_v36 = vld [vmem:[#allocation3 + $0x18] sm:$0xf0]  ;;  %v2307_v44 = vld [vmem:[#allocation3 + $0x70] sm:$0xf0] }
  0x28   : > { %v2270_v38 = vor.u32 %v2866_v35, %v2267_v36  ;;  %v347_v40 = vld [vmem:[#allocation2 + $0x8] sm:$0xff]  ;;  %v2310_v45 = vor.u32 %v2877_v43, %v2307_v44  ;;  %v348_v46 = vld [vmem:[#allocation2 + $0x10] sm:$0xff]  ;;  %v2873_v52 = vld [vmem:[#allocation3 + $0x44] sm:$0xf]  ;;  %s3174_s18 = sshra.s32 %s2084_s17, 4  ;;  %s3180_s27 = scalar_lea.hbm %s3807_s6, 256  ;;  %s3175_s18 = int_to_ptr.hbm [resolvable:$true] %s3174_s18 }
  0x29   : > { %453 = vmatpush.bf16.msra.mxu0 %v2861_v3  ;;  %v2291_v53 = vld [vmem:[#allocation3 + $0x50] sm:$0xf0]  ;;  %v349_v54 = vld [vmem:[#allocation2 + $0x18] sm:$0xff]  ;;  %v2869_v58 = vld [vmem:[#allocation3 + $0x24] sm:$0xf]  ;;  %s3176_s19 = scalar_lea.hbm %s3175_s18, 128  ;;  %p3181_p5 = scmp.lt.s32.totalorder %s3175_s18, %s3807_s6 }
  0x2a   : > { %635 = vmatpush.bf16.msra.mxu1 %v2274_v21  ;;  %3015 = vmatpush.bf16.msra.mxu2 %v2274_v21  ;;  %v2294_v55 = vor.u32 %v2873_v52, %v2291_v53  ;;  %v2275_v59 = vld [vmem:[#allocation3 + $0x30] sm:$0xf0]  ;;  %v2865_v61 = vld [vmem:[#allocation3 + $0x4] sm:$0xf]  ;;  %v2297_v10 = vld [vmem:[#allocation3 + $0x48] sm:$0xf]  ;;  %p3177_p1 = scmp.ne.s32.totalorder %s3175_s18, %s3176_s19  ;;  %p3182_p6 = scmp.lt.s32.totalorder %s3180_s27, %s3176_s19 }
  0x2b   : > { %3016 = vmatpush.bf16.msra.mxu3 %v2274_v21  ;;  %v2278_v60 = vor.u32 %v2869_v58, %v2275_v59  ;;  %v2259_v62 = vld [vmem:[#allocation3 + $0x10] sm:$0xf0]  ;;  %v350_v63 = vld [vmem:[#allocation2 + $0x20] sm:$0xff]  ;;  %v2281_v13 = vld [vmem:[#allocation3 + $0x28] sm:$0xf] }
  0x2c   : > { %v2262_v0 = vor.u32 %v2865_v61, %v2259_v62  ;;  %v2872_v14 = vld [vmem:[#allocation3 + $0x34] sm:$0xf0]  ;;  %v2265_v18 = vld [vmem:[#allocation3 + $0x8] sm:$0xf]  ;;  %v352_v20 = vld [vmem:[#allocation2 + $0x30] sm:$0xff]  ;;  %p3178_p2 = pnand %p3177_p1, %p3330_p4  ;;  %p3183_p7 = por %p3182_p6, %p3181_p5 }
  0x2d   : > { %454 = vmatpush.bf16.msra.mxu0 %v2860_v4  ;;  %v2282_v17 = vor.u32 %v2872_v14, %v2281_v13  ;;  %v2868_v19 = vld [vmem:[#allocation3 + $0x14] sm:$0xf0]  ;;  %v2433_v36 = vld [vmem:[#allocation6 + $0xc0] sm:$0xf]  ;;  %v2899_v43 = vld [vmem:[#allocation6 + $0x8c] sm:$0xf0] }
  0x2e   : > { %636 = vmatpush.bf16.msra.mxu1 %v2258_v24  ;;  %3017 = vmatpush.bf16.msra.mxu2 %v2258_v24  ;;  %v2266_v21 = vor.u32 %v2868_v19, %v2265_v18  ;;  %v2891_v52 = vld [vmem:[#allocation6 + $0x4c] sm:$0xf0]  ;;  %v2817_v53 = vld [vmem:[#allocation6 + $0x3c0] sm:$0xf]  ;;  %p3179_p3 = pneg %p3178_p2 }
  0x2f   : > { %3018 = vmatpush.bf16.msra.mxu3 %v2258_v24  ;;  %v2887_v58 = vld [vmem:[#allocation6 + $0x2c] sm:$0xf0]  ;;  %v2801_v59 = vld [vmem:[#allocation6 + $0x3a0] sm:$0xf] }
  0x30   : > { %v2999_v61 = vld [vmem:[#allocation6 + $0x3ac] sm:$0xf0]  ;;  %v2561_v14 = vld [vmem:[#allocation6 + $0x1c0] sm:$0xf]  ;;  %p3184_p9 = pnand %p3183_p7, %p3179_p3 }
  0x31   : > { %455 = vmatpush.bf16.msra.mxu0 %v2859_v5  ;;  %v2802_v62 = vor.u32 %v2999_v61, %v2801_v59  ;;  %v2975_v18 = vld [vmem:[#allocation6 + $0x2ec] sm:$0xf0]  ;;  %v2641_v59 = vld [vmem:[#allocation6 + $0x260] sm:$0xf] }
  0x32   : > { %720 = vmatpush.bf16.msrb.mxu1 %v2318_v27  ;;  %662 = vmatpush.bf16.msrb.mxu2 %v2310_v45  ;;  %v353_v27 = vld [vmem:[#allocation2 + $0x38] sm:$0xff]  ;;  %v2385_v45 = vld [vmem:[#allocation6 + $0x60] sm:$0xf] }
  0x35   : > { %456 = vmatpush.bf16.msra.mxu0 %v2858_v6  ;;  %v2313_v6 = vld [vmem:[#allocation3 + $0x68] sm:$0xf] }
  0x36   : > { %721 = vmatpush.bf16.msrb.mxu1 %v2302_v30  ;;  %663 = vmatpush.bf16.msrb.mxu2 %v2294_v55  ;;  %v3003_v55 = vld [vmem:[#allocation6 + $0x3cc] sm:$0xf0] }
  0x39   : > { %457 = vmatpush.bf16.msra.mxu0 %v2857_v7  ;;  %v2880_v7 = vld [vmem:[#allocation3 + $0x74] sm:$0xf0] }
  0x3a   : > { %722 = vmatpush.bf16.msrb.mxu1 %v2286_v33  ;;  %664 = vmatpush.bf16.msrb.mxu2 %v2278_v60  ;;  %v2449_v33 = vld [vmem:[#allocation6 + $0xe0] sm:$0xf] }
  0x3c   : > { %458 = vmatmul.bf16.vlgmr.msra.gmra.mxu0 %v2853_v8  ;;  %v2314_v8 = vor.u32 %v2880_v7, %v2313_v6  ;;  %v2943_v6 = vld [vmem:[#allocation6 + $0x1ec] sm:$0xf0] }
  0x3e   : > { %723 = vmatpush.bf16.msrb.mxu1 %v2270_v38  ;;  %665 = vmatpush.bf16.msrb.mxu2 %v2262_v0  ;;  %v2883_v0 = vld [vmem:[#allocation6 + $0xc] sm:$0xf0] }
  0x3f   : > { %691 = vmatpush.bf16.msrb.mxu3 %v2314_v8  ;;  %v2769_v8 = vld [vmem:[#allocation6 + $0x360] sm:$0xf] }
  0x4c   : > { %463 = vmatmul.bf16.gmra.mxu0 %v2854_v9  ;;  %v351_v9 = vld [vmem:[#allocation2 + $0x28] sm:$0xff] }
  0x5c   : > { %468 = vmatmul.bf16.gmra.mxu0 %v2855_v11  ;;  %v2876_v11 = vld [vmem:[#allocation3 + $0x54] sm:$0xf0] }
  0x6c   : > { %473 = vmatmul.bf16.gmra.mxu0 %v2856_v12  ;;  %v2298_v12 = vor.u32 %v2876_v11, %v2297_v10  ;;  %v2753_v11 = vld [vmem:[#allocation6 + $0x340] sm:$0xf] }
  0x6e   : > { %692 = vmatpush.bf16.msrb.mxu3 %v2298_v12  ;;  %v2987_v12 = vld [vmem:[#allocation6 + $0x34c] sm:$0xf0] }
  0x6f   : > { %v2754_v13 = vor.u32 %v2987_v12, %v2753_v11  ;;  %v2901_v11 = vld [vmem:[#allocation6 + $0xa4] sm:$0xf] }
  0x72   : > { %693 = vmatpush.bf16.msrb.mxu3 %v2282_v17 }
  0x76   : > { %694 = vmatpush.bf16.msrb.mxu3 %v2266_v21  ;;  %v2983_v21 = vld [vmem:[#allocation6 + $0x32c] sm:$0xf0] }
  0xb9   : > { %v459_v37 = vpop.f32.mrf.mxu0 }
  0xba   : > { %v479_v39 = vadd.f32 %v459_v37, %v346_v34  ;;  %v2911_v34 = vld [vmem:[#allocation6 + $0xec] sm:$0xf0] }
  0xbb   : > { %v2450_v35 = vor.u32 %v2911_v34, %v2449_v33  ;;  %v2907_v37 = vld [vmem:[#allocation6 + $0xcc] sm:$0xf0] }
  0xbc   : > { %488 = vst.msk [vmem:[#allocation2] sm:$0xff] %vm337_vm0, %v479_v39  ;;  %v2434_v38 = vor.u32 %v2907_v37, %v2433_v36  ;;  %v2417_v39 = vld [vmem:[#allocation6 + $0xa0] sm:$0xf]  ;;  %v2931_v36 = vld [vmem:[#allocation6 + $0x18c] sm:$0xf0] }
  0xbd   : > { %v2673_v37 = vld [vmem:[#allocation6 + $0x2a0] sm:$0xf] }
  0xc1   : > { %v461_v41 = vpop.f32.mrf.mxu0 }
  0xc2   : > { %v480_v42 = vadd.f32 %v461_v41, %v347_v40  ;;  %v2903_v40 = vld [vmem:[#allocation6 + $0xac] sm:$0xf0] }
  0xc3   : > { %v499_v49 = vld [vmem:[#allocation2] sm:$0xff]  ;;  %v2418_v41 = vor.u32 %v2903_v40, %v2417_v39  ;;  %v2967_v39 = vld [vmem:[#allocation6 + $0x2ac] sm:$0xf0] }
  0xc4   : > { %489 = vst.msk [vmem:[#allocation2 + $0x8] sm:$0xff] %vm337_vm0, %v480_v42  ;;  %v2401_v42 = vld [vmem:[#allocation6 + $0x80] sm:$0xf] }
  0xc5   : > { %v2402_v44 = vor.u32 %v2899_v43, %v2401_v42 }
  0xc9   : > { %v464_v47 = vpop.f32.mrf.mxu0 }
  0xca   : > { %v481_v48 = vadd.f32 %v464_v47, %v348_v46  ;;  %v2895_v46 = vld [vmem:[#allocation6 + $0x6c] sm:$0xf0]  ;;  %v2833_v47 = vld [vmem:[#allocation6 + $0x3e0] sm:$0xf] }
  0xcb   : > { %v500_v50 = vld [vmem:[#allocation2 + $0x8] sm:$0xff] }
  0xcc   : > { %490 = vst.msk [vmem:[#allocation2 + $0x10] sm:$0xff] %vm337_vm0, %v481_v48  ;;  %v3412_v51 = vpack.c.bf16 %v500_v50, %v499_v49  ;;  %v2386_v48 = vor.u32 %v2895_v46, %v2385_v45  ;;  %v3007_v49 = vld [vmem:[#allocation6 + $0x3ec] sm:$0xf0] }
  0xcd   : > { %v2834_v50 = vor.u32 %v3007_v49, %v2833_v47  ;;  %v2513_v47 = vld [vmem:[#allocation6 + $0x160] sm:$0xf] }
  0xce   : > { %2319 = vmatmul.msk.bf16.vlgmr.msra.gmra.mxu1 %vm337_vm0, %v3412_v51  ;;  %v2657_v49 = vld [vmem:[#allocation6 + $0x280] sm:$0xf] }
  0xcf   : > { %1658 = vmatpush.bf16.msra.mxu1 %v2834_v50 }
  0xd1   : > { %v466_v56 = vpop.f32.mrf.mxu0 }
  0xd2   : > { %v482_v57 = vadd.f32 %v466_v56, %v349_v54  ;;  %v2818_v56 = vor.u32 %v3003_v55, %v2817_v53  ;;  %v2909_v55 = vld [vmem:[#allocation6 + $0xe4] sm:$0xf] }
  0xd3   : > { %v501_v3 = vld [vmem:[#allocation2 + $0x10] sm:$0xff] }
  0xd4   : > { %491 = vst.msk [vmem:[#allocation2 + $0x18] sm:$0xff] %vm337_vm0, %v482_v57  ;;  %1659 = vmatpush.bf16.msra.mxu1 %v2818_v56  ;;  %v2353_v57 = vld [vmem:[#allocation6 + $0x20] sm:$0xf]  ;;  %v2451_v56 = vld [vmem:[#allocation6 + $0xf0] sm:$0xf0] }
  0xd5   : > { %v2354_v60 = vor.u32 %v2887_v58, %v2353_v57  ;;  %v2497_v57 = vld [vmem:[#allocation6 + $0x140] sm:$0xf]  ;;  %v2923_v58 = vld [vmem:[#allocation6 + $0x14c] sm:$0xf0] }
  0xd8   : > { %1660 = vmatpush.bf16.msra.mxu1 %v2802_v62  ;;  %v2498_v62 = vor.u32 %v2923_v58, %v2497_v57  ;;  %v2993_v58 = vld [vmem:[#allocation6 + $0x384] sm:$0xf] }
  0xd9   : > { %v469_v1 = vpop.f32.mrf.mxu0 }
  0xda   : > { %v483_v2 = vadd.f32 %v469_v1, %v350_v63  ;;  %v2337_v63 = vld [vmem:[#allocation6] sm:$0xf] }
  0xdb   : > { %v502_v4 = vld [vmem:[#allocation2 + $0x18] sm:$0xff]  ;;  %v2785_v1 = vld [vmem:[#allocation6 + $0x380] sm:$0xf] }
  0xdc   : > { %492 = vst.msk [vmem:[#allocation2 + $0x20] sm:$0xff] %vm337_vm0, %v483_v2  ;;  %v508_v5 = vpack.c.bf16 %v502_v4, %v501_v3  ;;  %v2338_v2 = vor.u32 %v2883_v0, %v2337_v63  ;;  %v2995_v3 = vld [vmem:[#allocation6 + $0x38c] sm:$0xf0] }
  0xdd   : > { %v2786_v4 = vor.u32 %v2995_v3, %v2785_v1  ;;  %v2959_v63 = vld [vmem:[#allocation6 + $0x26c] sm:$0xf0]  ;;  %v2905_v3 = vld [vmem:[#allocation6 + $0xc4] sm:$0xf] }
  0xde   : > { %2320 = vmatmul.msk.bf16.vlgmr.msra.gmra.mxu2 %vm337_vm0, %v508_v5  ;;  %2331 = vmatmul.msk.bf16.vlgmr.msrb.gmra.mxu1 %vm337_vm0, %v3412_v51  ;;  %v2642_v1 = vor.u32 %v2959_v63, %v2641_v59  ;;  %v2787_v59 = vld [vmem:[#allocation6 + $0x390] sm:$0xf0]  ;;  %v2885_v63 = vld [vmem:[#allocation6 + $0x24] sm:$0xf] }
  0xdf   : > { %1571 = vmatpush.bf16.msra.mxu2 %v2450_v35  ;;  %1661 = vmatpush.bf16.msra.mxu1 %v2786_v4  ;;  %v2529_v35 = vld [vmem:[#allocation6 + $0x180] sm:$0xf]  ;;  %v2435_v4 = vld [vmem:[#allocation6 + $0xd0] sm:$0xf0] }
  0xe1   : > { %v471_v15 = vpop.f32.mrf.mxu0 }
  0xe2   : > { %v484_v16 = vadd.f32 %v471_v15, %v351_v9  ;;  %v2991_v9 = vld [vmem:[#allocation6 + $0x36c] sm:$0xf0] }
  0xe3   : > { %v503_v24 = vld [vmem:[#allocation2 + $0x20] sm:$0xff]  ;;  %1572 = vmatpush.bf16.msra.mxu2 %v2434_v38  ;;  %v2770_v10 = vor.u32 %v2991_v9, %v2769_v8  ;;  %v2939_v15 = vld [vmem:[#allocation6 + $0x1cc] sm:$0xf0]  ;;  %v2530_v38 = vor.u32 %v2931_v36, %v2529_v35 }
  0xe4   : > { %493 = vst.msk [vmem:[#allocation2 + $0x28] sm:$0xff] %vm337_vm0, %v484_v16  ;;  %v2705_v16 = vld [vmem:[#allocation6 + $0x2e0] sm:$0xf]  ;;  %v2562_v17 = vor.u32 %v2939_v15, %v2561_v14  ;;  %v2419_v15 = vld [vmem:[#allocation6 + $0xb0] sm:$0xf0] }
  0xe5   : > { %1662 = vmatpush.bf16.msra.mxu1 %v2770_v10  ;;  %v2706_v19 = vor.u32 %v2975_v18, %v2705_v16  ;;  %v2481_v9 = vld [vmem:[#allocation6 + $0x120] sm:$0xf]  ;;  %v2919_v10 = vld [vmem:[#allocation6 + $0x12c] sm:$0xf0]  ;;  %v3001_v36 = vld [vmem:[#allocation6 + $0x3c4] sm:$0xf] }
  0xe6   : > { %v2482_v14 = vor.u32 %v2919_v10, %v2481_v9  ;;  %v2955_v18 = vld [vmem:[#allocation6 + $0x24c] sm:$0xf0]  ;;  %v2579_v10 = vld [vmem:[#allocation6 + $0x1f0] sm:$0xf0] }
  0xe7   : > { %1573 = vmatpush.bf16.msra.mxu2 %v2418_v41  ;;  %1629 = vmatpush.bf16.msrb.mxu0 %v2706_v19  ;;  %v2674_v41 = vor.u32 %v2967_v39, %v2673_v37  ;;  %v2422_v19 = vor.u32 %v2901_v11, %v2419_v15  ;;  %v2819_v37 = vld [vmem:[#allocation6 + $0x3d0] sm:$0xf0]  ;;  %v2989_v11 = vld [vmem:[#allocation6 + $0x364] sm:$0xf] }
  0xe8   : > { %v2822_v39 = vor.u32 %v3001_v36, %v2819_v37  ;;  %v2739_v36 = vld [vmem:[#allocation6 + $0x330] sm:$0xf0] }
  0xe9   : > { %v474_v22 = vpop.f32.mrf.mxu0  ;;  %1663 = vmatpush.bf16.msra.mxu1 %v2754_v13 }
  0xea   : > { %v485_v23 = vadd.f32 %v474_v22, %v352_v20  ;;  %v2737_v20 = vld [vmem:[#allocation6 + $0x320] sm:$0xf] }
  0xeb   : > { %v504_v25 = vld [vmem:[#allocation2 + $0x28] sm:$0xff]  ;;  %1574 = vmatpush.bf16.msra.mxu2 %v2402_v44  ;;  %v2738_v22 = vor.u32 %v2983_v21, %v2737_v20  ;;  %v3005_v20 = vld [vmem:[#allocation6 + $0x3e4] sm:$0xf] }
  0xec   : > { %494 = vst.msk [vmem:[#allocation2 + $0x30] sm:$0xff] %vm337_vm0, %v485_v23  ;;  %v509_v26 = vpack.c.bf16 %v504_v25, %v503_v24  ;;  %v2721_v23 = vld [vmem:[#allocation6 + $0x300] sm:$0xf]  ;;  %v2979_v24 = vld [vmem:[#allocation6 + $0x30c] sm:$0xf0] }
  0xed   : > { %1664 = vmatpush.bf16.msra.mxu1 %v2738_v22  ;;  %v2722_v25 = vor.u32 %v2979_v24, %v2721_v23  ;;  %v2835_v23 = vld [vmem:[#allocation6 + $0x3f0] sm:$0xf0] }
  0xee   : > { %2321 = vmatmul.msk.bf16.gmra.mxu2 %vm337_vm0, %v509_v26  ;;  %2332 = vmatmul.msk.bf16.gmra.mxu1 %vm337_vm0, %v508_v5 }
  0xef   : > { %1575 = vmatpush.bf16.msra.mxu2 %v2386_v48  ;;  %v2927_v48 = vld [vmem:[#allocation6 + $0x16c] sm:$0xf0] }
  0xf0   : > { %v2514_v50 = vor.u32 %v2927_v48, %v2513_v47  ;;  %v2997_v48 = vld [vmem:[#allocation6 + $0x3a4] sm:$0xf] }
  0xf1   : > { %v476_v28 = vpop.f32.mrf.mxu0  ;;  %1665 = vmatpush.bf16.msra.mxu1 %v2722_v25  ;;  %v2838_v25 = vor.u32 %v3005_v20, %v2835_v23  ;;  %v2755_v23 = vld [vmem:[#allocation6 + $0x350] sm:$0xf0] }
  0xf2   : > { %v486_v29 = vadd.f32 %v476_v28, %v353_v27  ;;  %v2935_v27 = vld [vmem:[#allocation6 + $0x1ac] sm:$0xf0]  ;;  %v2689_v28 = vld [vmem:[#allocation6 + $0x2c0] sm:$0xf] }
  0xf3   : > { %v505_v30 = vld [vmem:[#allocation2 + $0x30] sm:$0xff] }
  0xf4   : > { %495 = vst.msk [vmem:[#allocation2 + $0x38] sm:$0xff] %vm337_vm0, %v486_v29 }
  0xf5   : > { %1774 = vmatpush.bf16.msrb.mxu1 %v2838_v25 }
  0xf9   : > { %1775 = vmatpush.bf16.msrb.mxu1 %v2822_v39 }
  0xfb   : > { %v506_v31 = vld [vmem:[#allocation2 + $0x38] sm:$0xff] }
  0xfc   : > { %v3426_v32 = vpack.c.bf16 %v506_v31, %v505_v30  ;;  %v2971_v30 = vld [vmem:[#allocation6 + $0x2cc] sm:$0xf0] }
  0xfd   : > { %v2690_v31 = vor.u32 %v2971_v30, %v2689_v28  ;;  %v2897_v28 = vld [vmem:[#allocation6 + $0x84] sm:$0xf] }
  0xfe   : > { %2322 = vmatmul.msk.bf16.vlgmr.msra.gmra.mxu3 %vm337_vm0, %v3426_v32  ;;  %2323 = vmatmul.msk.bf16.vlgmr.msrb.gmra.mxu2 %vm337_vm0, %v3412_v51 }
  0xff   : > { %2333 = vmatmul.msk.bf16.gmra.mxu1 %vm337_vm0, %v509_v26  ;;  %1630 = vmatpush.bf16.msrb.mxu0 %v2690_v31 }
 0x103   : > { %1631 = vmatpush.bf16.msrb.mxu0 %v2674_v41  ;;  %v2387_v41 = vld [vmem:[#allocation6 + $0x70] sm:$0xf0] }
 0x10e   : > { %2324 = vmatmul.msk.bf16.gmra.mxu2 %vm337_vm0, %v508_v5  ;;  %2327 = vmatmul.msk.bf16.vlgmr.msrb.gmra.mxu3 %vm337_vm0, %v3412_v51  ;;  %v2369_v51 = vld [vmem:[#allocation6 + $0x40] sm:$0xf] }
 0x10f   : > { %2334 = vmatmul.msk.bf16.gmra.mxu1 %vm337_vm0, %v3426_v32  ;;  %v2370_v54 = vor.u32 %v2891_v52, %v2369_v51  ;;  %v2963_v51 = vld [vmem:[#allocation6 + $0x28c] sm:$0xf0] }
 0x110   : > { %v2658_v52 = vor.u32 %v2963_v51, %v2657_v49  ;;  %v2803_v49 = vld [vmem:[#allocation6 + $0x3b0] sm:$0xf0] }
 0x111   : > { %1576 = vmatpush.bf16.msra.mxu2 %v2370_v54  ;;  %v2806_v51 = vor.u32 %v2997_v48, %v2803_v49  ;;  %v2933_v48 = vld [vmem:[#allocation6 + $0x1a4] sm:$0xf]  ;;  %v2547_v49 = vld [vmem:[#allocation6 + $0x1b0] sm:$0xf0] }
 0x112   : > { %1632 = vmatpush.bf16.msrb.mxu0 %v2658_v52 }
 0x113   : > { %1776 = vmatpush.bf16.msrb.mxu1 %v2806_v51  ;;  %v2550_v51 = vor.u32 %v2933_v48, %v2547_v49 }
 0x115   : > { %1577 = vmatpush.bf16.msra.mxu2 %v2354_v60  ;;  %v2454_v60 = vor.u32 %v2909_v55, %v2451_v56  ;;  %v2371_v55 = vld [vmem:[#allocation6 + $0x50] sm:$0xf0] }
 0x116   : > { %1633 = vmatpush.bf16.msrb.mxu0 %v2642_v1 }
 0x119   : > { %1578 = vmatpush.bf16.msra.mxu2 %v2338_v2 }
 0x11d   : > { %1687 = vmatpush.bf16.msrb.mxu2 %v2454_v60 }
 0x11e   : > { %2325 = vmatmul.msk.bf16.gmra.mxu2 %vm337_vm0, %v509_v26  ;;  %2328 = vmatmul.msk.bf16.gmra.mxu3 %vm337_vm0, %v508_v5  ;;  %v2577_v5 = vld [vmem:[#allocation6 + $0x1e0] sm:$0xf] }
 0x11f   : > { %v2578_v7 = vor.u32 %v2943_v6, %v2577_v5  ;;  %v2438_v6 = vor.u32 %v2905_v3, %v2435_v4 }
 0x121   : > { %1600 = vmatpush.bf16.msra.mxu3 %v2578_v7  ;;  %1688 = vmatpush.bf16.msrb.mxu2 %v2438_v6  ;;  %v2947_v6 = vld [vmem:[#allocation6 + $0x20c] sm:$0xf0] }
 0x125   : > { %1601 = vmatpush.bf16.msra.mxu3 %v2562_v17  ;;  %v2625_v17 = vld [vmem:[#allocation6 + $0x240] sm:$0xf]  ;;  %1689 = vmatpush.bf16.msrb.mxu2 %v2422_v19 }
 0x126   : > { %v2626_v22 = vor.u32 %v2955_v18, %v2625_v17  ;;  %v2339_v17 = vld [vmem:[#allocation6 + $0x10] sm:$0xf0] }
 0x128   : > { %1634 = vmatpush.bf16.msrb.mxu0 %v2626_v22  ;;  %v2985_v22 = vld [vmem:[#allocation6 + $0x344] sm:$0xf] }
 0x129   : > { %v2758_v25 = vor.u32 %v2985_v22, %v2755_v23  ;;  %v2961_v23 = vld [vmem:[#allocation6 + $0x284] sm:$0xf] }
 0x12e   : > { %2326 = vmatmul.msk.bf16.gmra.mxu2 %vm337_vm0, %v3426_v32  ;;  %2329 = vmatmul.msk.bf16.gmra.mxu3 %vm337_vm0, %v509_v26  ;;  %v2545_v26 = vld [vmem:[#allocation6 + $0x1a0] sm:$0xf] }
 0x12f   : > { %v2546_v29 = vor.u32 %v2935_v27, %v2545_v26  ;;  %v2465_v26 = vld [vmem:[#allocation6 + $0x100] sm:$0xf]  ;;  %v2915_v27 = vld [vmem:[#allocation6 + $0x10c] sm:$0xf0] }
 0x130   : > { %v2466_v31 = vor.u32 %v2915_v27, %v2465_v26 }
 0x131   : > { %1602 = vmatpush.bf16.msra.mxu3 %v2546_v29 }
 0x135   : > { %1603 = vmatpush.bf16.msra.mxu3 %v2530_v38 }
 0x139   : > { %1604 = vmatpush.bf16.msra.mxu3 %v2514_v50 }
 0x13d   : > { %1605 = vmatpush.bf16.msra.mxu3 %v2498_v62  ;;  %v2790_v62 = vor.u32 %v2993_v58, %v2787_v59 }
 0x13e   : > { %2330 = vmatmul.msk.bf16.gmra.mxu3 %vm337_vm0, %v3426_v32  ;;  %v3448_v32 = vld [vmem:[%s3804_s3] sm:$0xf] }
 0x13f   : > { %v3451_v34 = vperm.slane %v3448_v32, 0  ;;  %v3459_v54 = vperm.slane %v3448_v32, 3  ;;  %1777 = vmatpush.bf16.msrb.mxu1 %v2790_v62 }
 0x141   : > { %1606 = vmatpush.bf16.msra.mxu3 %v2482_v14 }
 0x145   : > { %1607 = vmatpush.bf16.msra.mxu3 %v2466_v31 }
 0x14b   : > { %v638_v33 = vpop.f32.mrf.mxu1 }
 0x14c   : > { %v639_v40 = vadd.f32 %v638_v33, %v3451_v34  ;;  %v2403_v33 = vld [vmem:[#allocation6 + $0x90] sm:$0xf0] }
 0x14d   : > { %v2406_v35 = vor.u32 %v2897_v28, %v2403_v33  ;;  %v2937_v28 = vld [vmem:[#allocation6 + $0x1c4] sm:$0xf]  ;;  %v2707_v33 = vld [vmem:[#allocation6 + $0x2f0] sm:$0xf0] }
 0x14e   : > { %v745_v44 = vmax.f32 %v639_v40, 0.0  ;;  %v2893_v40 = vld [vmem:[#allocation6 + $0x64] sm:$0xf] }
 0x14f   : > { %1690 = vmatpush.bf16.msrb.mxu2 %v2406_v35  ;;  %v2981_v35 = vld [vmem:[#allocation6 + $0x324] sm:$0xf] }
 0x153   : > { %v640_v42 = vpop.f32.mrf.mxu1 }
 0x154   : > { %v641_v43 = vadd.f32 %v640_v42, %v3451_v34  ;;  %v2609_v42 = vld [vmem:[#allocation6 + $0x220] sm:$0xf] }
 0x156   : > { %v749_v45 = vmax.f32 %v641_v43, 0.0  ;;  %v2951_v43 = vld [vmem:[#allocation6 + $0x22c] sm:$0xf0] }
 0x157   : > { %v2610_v47 = vor.u32 %v2951_v43, %v2609_v42  ;;  %v2977_v43 = vld [vmem:[#allocation6 + $0x304] sm:$0xf] }
 0x158   : > { %v3455_v46 = vpack.c.bf16 %v749_v45, %v745_v44  ;;  %v2390_v44 = vor.u32 %v2893_v40, %v2387_v41  ;;  %v2742_v40 = vor.u32 %v2981_v35, %v2739_v36  ;;  %v3483_v41 = vperm.slane %v3448_v32, 1 }
 0x159   : > { %1635 = vmatpush.bf16.msrb.mxu0 %v2610_v47 }
 0x15a   : > { %1579 = vmatmul.bf16.vlgmr.msra.gmra.mxu2 %v3455_v46 }
 0x15b   : > { %v725_v53 = vpop.f32.mrf.mxu1  ;;  %1691 = vmatpush.bf16.msrb.mxu2 %v2390_v44  ;;  %v2723_v44 = vld [vmem:[#allocation6 + $0x310] sm:$0xf0] }
 0x15c   : > { %v726_v0 = vadd.f32 %v725_v53, %v3459_v54  ;;  %v2889_v53 = vld [vmem:[#allocation6 + $0x44] sm:$0xf]  ;;  %v2726_v47 = vor.u32 %v2977_v43, %v2723_v44  ;;  %v2457_v44 = vld [vmem:[#allocation6 + $0xe8] sm:$0xf] }
 0x15d   : > { %v2374_v57 = vor.u32 %v2889_v53, %v2371_v55 }
 0x15e   : > { %v748_v7 = vmax.f32 %v726_v0, 0.0  ;;  %v2355_v0 = vld [vmem:[#allocation6 + $0x30] sm:$0xf0] }
 0x15f   : > { %1692 = vmatpush.bf16.msrb.mxu2 %v2374_v57  ;;  %v2358_v3 = vor.u32 %v2885_v63, %v2355_v0 }
 0x161   : > { %v643_v61 = vpop.f32.mrf.mxu2 }
 0x162   : > { %v644_v12 = vadd.f32 %v643_v61, %v3451_v34 }
 0x163   : > { %v727_v2 = vpop.f32.mrf.mxu1  ;;  %1693 = vmatpush.bf16.msrb.mxu2 %v2358_v3 }
 0x164   : > { %v728_v5 = vadd.f32 %v727_v2, %v3459_v54  ;;  %v753_v29 = vmax.f32 %v644_v12, 0.0  ;;  %v2771_v12 = vld [vmem:[#allocation6 + $0x370] sm:$0xf0] }
 0x165   : > { %v2774_v15 = vor.u32 %v2989_v11, %v2771_v12  ;;  %v2965_v11 = vld [vmem:[#allocation6 + $0x2a4] sm:$0xf] }
 0x166   : > { %v752_v8 = vmax.f32 %v728_v5, 0.0  ;;  %v2593_v5 = vld [vmem:[#allocation6 + $0x200] sm:$0xf] }
 0x167   : > { %v2594_v9 = vor.u32 %v2947_v6, %v2593_v5  ;;  %1778 = vmatpush.bf16.msrb.mxu1 %v2774_v15 }
 0x168   : > { %v3464_v13 = vpack.c.bf16 %v752_v8, %v748_v7  ;;  %v2941_v7 = vld [vmem:[#allocation6 + $0x1e4] sm:$0xf] }
 0x169   : > { %v645_v16 = vpop.f32.mrf.mxu2  ;;  %v2582_v14 = vor.u32 %v2941_v7, %v2579_v10  ;;  %1636 = vmatpush.bf16.msrb.mxu0 %v2594_v9  ;;  %v2531_v10 = vld [vmem:[#allocation6 + $0x190] sm:$0xf0] }
 0x16a   : > { %v646_v21 = vadd.f32 %v645_v16, %v3451_v34  ;;  %1666 = vmatmul.bf16.vlgmr.msra.gmra.mxu1 %v3464_v13  ;;  %v2881_v16 = vld [vmem:[#allocation6 + $0x4] sm:$0xf] }
 0x16b   : > { %v730_v24 = vpop.f32.mrf.mxu1  ;;  %1716 = vmatpush.bf16.msrb.mxu3 %v2582_v14  ;;  %1779 = vmatpush.bf16.msrb.mxu1 %v2758_v25  ;;  %v2675_v14 = vld [vmem:[#allocation6 + $0x2b0] sm:$0xf0] }
 0x16c   : > { %v757_v30 = vmax.f32 %v646_v21, 0.0  ;;  %v731_v50 = vadd.f32 %v730_v24, %v3459_v54  ;;  %v2342_v21 = vor.u32 %v2881_v16, %v2339_v17  ;;  %v2678_v16 = vor.u32 %v2965_v11, %v2675_v14  ;;  %v2659_v25 = vld [vmem:[#allocation6 + $0x290] sm:$0xf0]  ;;  %v3008_v14 = vld [vmem:[#allocation6 + $0x3f4] sm:$0xf0] }
 0x16d   : > { %v3501_v17 = vperm.slane %v3448_v32, 2 }
 0x16e   : > { %v3468_v38 = vpack.c.bf16 %v757_v30, %v753_v29  ;;  %v756_v60 = vmax.f32 %v731_v50, 0.0  ;;  %1694 = vmatpush.bf16.msrb.mxu2 %v2342_v21  ;;  %v2563_v29 = vld [vmem:[#allocation6 + $0x1d0] sm:$0xf0]  ;;  %v2973_v30 = vld [vmem:[#allocation6 + $0x2e4] sm:$0xf] }
 0x16f   : > { %v2566_v31 = vor.u32 %v2937_v28, %v2563_v29  ;;  %v2710_v39 = vor.u32 %v2973_v30, %v2707_v33  ;;  %1780 = vmatpush.bf16.msrb.mxu1 %v2742_v40  ;;  %v2969_v50 = vld [vmem:[#allocation6 + $0x2c4] sm:$0xf] }
 0x170   : > { %1584 = vmatmul.bf16.gmra.mxu2 %v3468_v38 }
 0x171   : > { %v648_v45 = vpop.f32.mrf.mxu2  ;;  %1717 = vmatpush.bf16.msrb.mxu3 %v2566_v31  ;;  %1745 = vmatpush.bf16.msra.mxu0 %v2710_v39 }
 0x172   : > { %v649_v1 = vadd.f32 %v648_v45, %v3451_v34 }
 0x173   : > { %v732_v52 = vpop.f32.mrf.mxu1  ;;  %1781 = vmatpush.bf16.msrb.mxu1 %v2726_v47 }
 0x174   : > { %v733_v56 = vadd.f32 %v732_v52, %v3459_v54  ;;  %v761_v18 = vmax.f32 %v649_v1, 0.0  ;;  %v2691_v52 = vld [vmem:[#allocation6 + $0x2d0] sm:$0xf0] }
 0x175   : > { %1718 = vmatpush.bf16.msrb.mxu3 %v2550_v51  ;;  %v2499_v51 = vld [vmem:[#allocation6 + $0x150] sm:$0xf0] }
 0x176   : > { %v760_v61 = vmax.f32 %v733_v56, 0.0  ;;  %v2694_v56 = vor.u32 %v2969_v50, %v2691_v52  ;;  %v2921_v50 = vld [vmem:[#allocation6 + $0x144] sm:$0xf] }
 0x177   : > { %v2957_v52 = vld [vmem:[#allocation6 + $0x264] sm:$0xf] }
 0x178   : > { %v3474_v2 = vpack.c.bf16 %v760_v61, %v756_v60  ;;  %1746 = vmatpush.bf16.msra.mxu0 %v2694_v56 }
 0x179   : > { %v650_v4 = vpop.f32.mrf.mxu2 }
 0x17a   : > { %v651_v8 = vadd.f32 %v650_v4, %v3451_v34  ;;  %1671 = vmatmul.bf16.gmra.mxu1 %v3474_v2 }
 0x17c   : > { %v765_v19 = vmax.f32 %v651_v8, 0.0  ;;  %v735_v20 = vpop.f32.mrf.mxu1  ;;  %1747 = vmatpush.bf16.msra.mxu0 %v2678_v16 }
 0x17d   : > { %v736_v37 = vadd.f32 %v735_v20, %v3459_v54  ;;  %v2515_v20 = vld [vmem:[#allocation6 + $0x170] sm:$0xf0] }
 0x17e   : > { %v3478_v24 = vpack.c.bf16 %v765_v19, %v761_v18  ;;  %v2925_v19 = vld [vmem:[#allocation6 + $0x164] sm:$0xf] }
 0x17f   : > { %v764_v53 = vmax.f32 %v736_v37, 0.0  ;;  %v2518_v22 = vor.u32 %v2925_v19, %v2515_v20  ;;  %v2913_v20 = vld [vmem:[#allocation6 + $0x104] sm:$0xf] }
 0x180   : > { %1589 = vmatmul.bf16.gmra.mxu2 %v3478_v24 }
 0x181   : > { %v653_v26 = vpop.f32.mrf.mxu3  ;;  %v667_v27 = vpop.f32.mrf.mxu2 }
 0x182   : > { %v654_v57 = vadd.f32 %v653_v26, %v3451_v34  ;;  %v668_v58 = vadd.f32 %v667_v27, %v3483_v41  ;;  %v2662_v26 = vor.u32 %v2961_v23, %v2659_v25 }
 0x184   : > { %v737_v42 = vpop.f32.mrf.mxu1  ;;  %v769_v0 = vmax.f32 %v654_v57, 0.0  ;;  %v746_v1 = vmax.f32 %v668_v58, 0.0  ;;  %1748 = vmatpush.bf16.msra.mxu0 %v2662_v26  ;;  %v2441_v57 = vld [vmem:[#allocation6 + $0xc8] sm:$0xf]  ;;  %v2908_v58 = vld [vmem:[#allocation6 + $0xd4] sm:$0xf0] }
 0x185   : > { %v738_v45 = vadd.f32 %v737_v42, %v3459_v54 }
 0x187   : > { %v768_v55 = vmax.f32 %v738_v45, 0.0  ;;  %v2912_v45 = vld [vmem:[#allocation6 + $0xf4] sm:$0xf0] }
 0x188   : > { %v2458_v47 = vor.u32 %v2912_v45, %v2457_v44  ;;  %v2949_v45 = vld [vmem:[#allocation6 + $0x224] sm:$0xf] }
 0x189   : > { %v3488_v59 = vpack.c.bf16 %v768_v55, %v764_v53  ;;  %v655_v60 = vpop.f32.mrf.mxu3  ;;  %v669_v61 = vpop.f32.mrf.mxu2  ;;  %v2502_v53 = vor.u32 %v2921_v50, %v2499_v51  ;;  %v2643_v55 = vld [vmem:[#allocation6 + $0x270] sm:$0xf0]  ;;  %v3000_v50 = vld [vmem:[#allocation6 + $0x3b4] sm:$0xf0]  ;;  %v2377_v51 = vld [vmem:[#allocation6 + $0x48] sm:$0xf] }
 0x18a   : > { %v656_v62 = vadd.f32 %v655_v60, %v3451_v34  ;;  %v670_v63 = vadd.f32 %v669_v61, %v3483_v41  ;;  %v2929_v34 = vld [vmem:[#allocation6 + $0x184] sm:$0xf]  ;;  %1803 = vmatpush.bf16.msra.mxu2 %v2458_v47  ;;  %v2646_v56 = vor.u32 %v2957_v52, %v2643_v55  ;;  %v2442_v60 = vor.u32 %v2908_v58, %v2441_v57  ;;  %v2611_v47 = vld [vmem:[#allocation6 + $0x230] sm:$0xf0]  ;;  %v2892_v52 = vld [vmem:[#allocation6 + $0x54] sm:$0xf0] }
 0x18b   : > { %1676 = vmatmul.bf16.gmra.mxu1 %v3488_v59  ;;  %v2534_v12 = vor.u32 %v2929_v34, %v2531_v10  ;;  %v2917_v61 = vld [vmem:[#allocation6 + $0x124] sm:$0xf]  ;;  %v2378_v55 = vor.u32 %v2892_v52, %v2377_v51  ;;  %v2996_v57 = vld [vmem:[#allocation6 + $0x394] sm:$0xf0]  ;;  %v2553_v51 = vld [vmem:[#allocation6 + $0x1a8] sm:$0xf] }
 0x18c   : > { %v773_v3 = vmax.f32 %v656_v62, 0.0  ;;  %v750_v4 = vmax.f32 %v670_v63, 0.0  ;;  %v740_v5 = vpop.f32.mrf.mxu1  ;;  %v2483_v62 = vld [vmem:[#allocation6 + $0x130] sm:$0xf0]  ;;  %1749 = vmatpush.bf16.msra.mxu0 %v2646_v56  ;;  %v2793_v56 = vld [vmem:[#allocation6 + $0x388] sm:$0xf] }
 0x18d   : > { %v741_v15 = vadd.f32 %v740_v5, %v3459_v54  ;;  %1719 = vmatpush.bf16.msrb.mxu3 %v2534_v12  ;;  %v2486_v63 = vor.u32 %v2917_v61, %v2483_v62  ;;  %v2425_v5 = vld [vmem:[#allocation6 + $0xa8] sm:$0xf]  ;;  %v2945_v58 = vld [vmem:[#allocation6 + $0x204] sm:$0xf]  ;;  %v2794_v62 = vor.u32 %v2996_v57, %v2793_v56  ;;  %v2936_v52 = vld [vmem:[#allocation6 + $0x1b4] sm:$0xf0] }
 0x18e   : > { %v3493_v6 = vpack.c.bf16 %v773_v3, %v769_v0  ;;  %v3495_v7 = vpack.c.bf16 %v750_v4, %v746_v1  ;;  %v2953_v0 = vld [vmem:[#allocation6 + $0x244] sm:$0xf]  ;;  %v2627_v1 = vld [vmem:[#allocation6 + $0x250] sm:$0xf0]  ;;  %1804 = vmatpush.bf16.msra.mxu2 %v2442_v60  ;;  %v2841_v12 = vld [vmem:[#allocation6 + $0x3e8] sm:$0xf]  ;;  %v2554_v56 = vor.u32 %v2936_v52, %v2553_v51 }
 0x18f   : > { %v772_v27 = vmax.f32 %v741_v15, 0.0  ;;  %v2630_v4 = vor.u32 %v2953_v0, %v2627_v1  ;;  %v2842_v19 = vor.u32 %v3008_v14, %v2841_v12  ;;  %v2595_v60 = vld [vmem:[#allocation6 + $0x210] sm:$0xf0]  ;;  %v2585_v61 = vld [vmem:[#allocation6 + $0x1e8] sm:$0xf] }
 0x190   : > { %1594 = vmatmul.bf16.gmra.mxu2 %v3493_v6  ;;  %1608 = vmatmul.bf16.vlgmr.msra.gmra.mxu3 %v3495_v7  ;;  %v2944_v0 = vld [vmem:[#allocation6 + $0x1f4] sm:$0xf0]  ;;  %v2361_v1 = vld [vmem:[#allocation6 + $0x28] sm:$0xf] }
 0x191   : > { %v672_v8 = vpop.f32.mrf.mxu2  ;;  %v696_v9 = vpop.f32.mrf.mxu3  ;;  %1720 = vmatpush.bf16.msrb.mxu3 %v2518_v22  ;;  %1750 = vmatpush.bf16.msra.mxu0 %v2630_v4  ;;  %v2409_v22 = vld [vmem:[#allocation6 + $0x88] sm:$0xf]  ;;  %v2586_v4 = vor.u32 %v2944_v0, %v2585_v61  ;;  %v2992_v12 = vld [vmem:[#allocation6 + $0x374] sm:$0xf0] }
 0x192   : > { %v673_v29 = vadd.f32 %v672_v8, %v3483_v41  ;;  %v697_v30 = vadd.f32 %v696_v9, %v3501_v17  ;;  %v2904_v8 = vld [vmem:[#allocation6 + $0xb4] sm:$0xf0]  ;;  %1890 = vmatpush.bf16.msra.mxu1 %v2842_v19  ;;  %v2345_v19 = vld [vmem:[#allocation6 + $0x8] sm:$0xf] }
 0x193   : > { %v2426_v34 = vor.u32 %v2904_v8, %v2425_v5  ;;  %v2972_v57 = vld [vmem:[#allocation6 + $0x2d4] sm:$0xf0] }
 0x194   : > { %v742_v18 = vpop.f32.mrf.mxu1  ;;  %v754_v36 = vmax.f32 %v673_v29, 0.0  ;;  %v747_v37 = vmax.f32 %v697_v30, 0.0  ;;  %v2825_v30 = vld [vmem:[#allocation6 + $0x3c8] sm:$0xf] }
 0x195   : > { %v743_v21 = vadd.f32 %v742_v18, %v3459_v54  ;;  %1721 = vmatpush.bf16.msrb.mxu3 %v2502_v53  ;;  %1805 = vmatpush.bf16.msra.mxu2 %v2426_v34 }
 0x197   : > { %v776_v28 = vmax.f32 %v743_v21, 0.0  ;;  %v2467_v21 = vld [vmem:[#allocation6 + $0x110] sm:$0xf0] }
 0x199   : > { %v3506_v32 = vpack.c.bf16 %v776_v28, %v772_v27  ;;  %v674_v31 = vpop.f32.mrf.mxu2  ;;  %v698_v33 = vpop.f32.mrf.mxu3  ;;  %1722 = vmatpush.bf16.msrb.mxu3 %v2486_v63  ;;  %v2470_v27 = vor.u32 %v2913_v20, %v2467_v21  ;;  %v2900_v28 = vld [vmem:[#allocation6 + $0x94] sm:$0xf0]  ;;  %v2598_v63 = vor.u32 %v2945_v58, %v2595_v60 }
 0x19a   : > { %v675_v35 = vadd.f32 %v674_v31, %v3483_v41  ;;  %v699_v54 = vadd.f32 %v698_v33, %v3501_v17  ;;  %v2410_v29 = vor.u32 %v2900_v28, %v2409_v22  ;;  %v3004_v31 = vld [vmem:[#allocation6 + $0x3d4] sm:$0xf0] }
 0x19b   : > { %1681 = vmatmul.bf16.gmra.mxu1 %v3506_v32  ;;  %v2884_v20 = vld [vmem:[#allocation6 + $0x14] sm:$0xf0] }
 0x19c   : > { %v758_v39 = vmax.f32 %v675_v35, 0.0  ;;  %v751_v40 = vmax.f32 %v699_v54, 0.0  ;;  %v2826_v54 = vor.u32 %v3004_v31, %v2825_v30  ;;  %1806 = vmatpush.bf16.msra.mxu2 %v2410_v29  ;;  %v2569_v31 = vld [vmem:[#allocation6 + $0x1c8] sm:$0xf] }
 0x19d   : > { %1723 = vmatpush.bf16.msrb.mxu3 %v2470_v27  ;;  %v2988_v27 = vld [vmem:[#allocation6 + $0x354] sm:$0xf0] }
 0x19e   : > { %v3511_v42 = vpack.c.bf16 %v758_v39, %v754_v36  ;;  %v3513_v43 = vpack.c.bf16 %v751_v40, %v747_v37  ;;  %v2393_v36 = vld [vmem:[#allocation6 + $0x68] sm:$0xf]  ;;  %v2896_v37 = vld [vmem:[#allocation6 + $0x74] sm:$0xf0]  ;;  %1891 = vmatpush.bf16.msra.mxu1 %v2826_v54 }
 0x19f   : > { %v2394_v39 = vor.u32 %v2896_v37, %v2393_v36  ;;  %v2940_v54 = vld [vmem:[#allocation6 + $0x1d4] sm:$0xf0]  ;;  %v2713_v36 = vld [vmem:[#allocation6 + $0x2e8] sm:$0xf] }
 0x1a0   : > { %1613 = vmatmul.bf16.gmra.mxu3 %v3511_v42  ;;  %1637 = vmatmul.bf16.vlgmr.msrb.gmra.mxu0 %v3513_v43  ;;  %v2570_v37 = vor.u32 %v2940_v54, %v2569_v31  ;;  %v2489_v54 = vld [vmem:[#allocation6 + $0x128] sm:$0xf] }
 0x1a1   : > { %1695 = vmatmul.bf16.vlgmr.msrb.gmra.mxu2 %v3455_v46  ;;  %v677_v48 = vpop.f32.mrf.mxu2  ;;  %v701_v49 = vpop.f32.mrf.mxu3  ;;  %1832 = vmatpush.bf16.msra.mxu3 %v2586_v4  ;;  %v2681_v4 = vld [vmem:[#allocation6 + $0x2a8] sm:$0xf] }
 0x1a2   : > { %v678_v3 = vadd.f32 %v677_v48, %v3483_v41  ;;  %v702_v9 = vadd.f32 %v701_v49, %v3501_v17  ;;  %v2809_v48 = vld [vmem:[#allocation6 + $0x3a8] sm:$0xf]  ;;  %v2614_v49 = vor.u32 %v2949_v45, %v2611_v47  ;;  %1807 = vmatpush.bf16.msra.mxu2 %v2394_v39  ;;  %v2976_v39 = vld [vmem:[#allocation6 + $0x2f4] sm:$0xf0] }
 0x1a3   : > { %v2810_v53 = vor.u32 %v3000_v50, %v2809_v48  ;;  %v2714_v45 = vor.u32 %v2976_v39, %v2713_v36  ;;  %v2729_v48 = vld [vmem:[#allocation6 + $0x308] sm:$0xf]  ;;  %v2920_v36 = vld [vmem:[#allocation6 + $0x134] sm:$0xf0] }
 0x1a4   : > { %v762_v15 = vmax.f32 %v678_v3, 0.0  ;;  %v755_v23 = vmax.f32 %v702_v9, 0.0  ;;  %1751 = vmatpush.bf16.msra.mxu0 %v2614_v49  ;;  %v2888_v3 = vld [vmem:[#allocation6 + $0x34] sm:$0xf0]  ;;  %v2490_v39 = vor.u32 %v2920_v36, %v2489_v54  ;;  %v2587_v54 = vld [vmem:[#allocation6 + $0x1f8] sm:$0xf0] }
 0x1a5   : > { %1892 = vmatpush.bf16.msra.mxu1 %v2810_v53  ;;  %v2362_v8 = vor.u32 %v2888_v3, %v2361_v1  ;;  %1833 = vmatpush.bf16.msra.mxu3 %v2570_v37  ;;  %v2980_v49 = vld [vmem:[#allocation6 + $0x314] sm:$0xf0]  ;;  %v2697_v53 = vld [vmem:[#allocation6 + $0x2c8] sm:$0xf]  ;;  %v2902_v37 = vld [vmem:[#allocation6 + $0xac] sm:$0xf] }
 0x1a6   : > { %1808 = vmatpush.bf16.msra.mxu2 %v2378_v55  ;;  %v2730_v50 = vor.u32 %v2980_v49, %v2729_v48  ;;  %v2698_v60 = vor.u32 %v2972_v57, %v2697_v53  ;;  %v2537_v1 = vld [vmem:[#allocation6 + $0x188] sm:$0xf]  ;;  %v2932_v3 = vld [vmem:[#allocation6 + $0x194] sm:$0xf0]  ;;  %v3006_v49 = vld [vmem:[#allocation6 + $0x3ec] sm:$0xf] }
 0x1a7   : > { %v2473_v53 = vld [vmem:[#allocation6 + $0x108] sm:$0xf]  ;;  %v2990_v36 = vld [vmem:[#allocation6 + $0x36c] sm:$0xf] }
 0x1a8   : > { %1752 = vmatpush.bf16.msra.mxu0 %v2598_v63 }
 0x1a9   : > { %v679_v10 = vpop.f32.mrf.mxu2  ;;  %v703_v11 = vpop.f32.mrf.mxu3  ;;  %1893 = vmatpush.bf16.msra.mxu1 %v2794_v62  ;;  %1834 = vmatpush.bf16.msra.mxu3 %v2554_v56  ;;  %v2898_v56 = vld [vmem:[#allocation6 + $0x8c] sm:$0xf] }
 0x1aa   : > { %v680_v16 = vadd.f32 %v679_v10, %v3483_v41  ;;  %v704_v18 = vadd.f32 %v703_v11, %v3501_v17  ;;  %v2777_v11 = vld [vmem:[#allocation6 + $0x368] sm:$0xf]  ;;  %1809 = vmatpush.bf16.msra.mxu2 %v2362_v8  ;;  %v2968_v8 = vld [vmem:[#allocation6 + $0x2b4] sm:$0xf0] }
 0x1ab   : > { %1782 = vmatmul.bf16.vlgmr.msrb.gmra.mxu1 %v3464_v13 }
 0x1ac   : > { %v766_v25 = vmax.f32 %v680_v16, 0.0  ;;  %v759_v26 = vmax.f32 %v704_v18, 0.0  ;;  %v2778_v16 = vor.u32 %v2992_v12, %v2777_v11  ;;  %1861 = vmatpush.bf16.msrb.mxu0 %v2714_v45  ;;  %v2964_v12 = vld [vmem:[#allocation6 + $0x294] sm:$0xf0]  ;;  %v2427_v45 = vld [vmem:[#allocation6 + $0xb8] sm:$0xf0] }
 0x1ad   : > { %v2430_v48 = vor.u32 %v2902_v37, %v2427_v45  ;;  %v2779_v37 = vld [vmem:[#allocation6 + $0x378] sm:$0xf0] }
 0x1ae   : > { %v3523_v33 = vpack.c.bf16 %v766_v25, %v762_v15  ;;  %v3525_v35 = vpack.c.bf16 %v759_v26, %v755_v23  ;;  %v2346_v25 = vor.u32 %v2884_v20, %v2345_v19  ;;  %1894 = vmatpush.bf16.msra.mxu1 %v2778_v16  ;;  %v2761_v26 = vld [vmem:[#allocation6 + $0x348] sm:$0xf]  ;;  %v2459_v16 = vld [vmem:[#allocation6 + $0xf8] sm:$0xf0] }
 0x1af   : > { %v2505_v20 = vld [vmem:[#allocation6 + $0x148] sm:$0xf] }
 0x1b0   : > { %1618 = vmatmul.bf16.gmra.mxu3 %v3523_v33  ;;  %1642 = vmatmul.bf16.gmra.mxu0 %v3525_v35 }
 0x1b1   : > { %1700 = vmatmul.bf16.gmra.mxu2 %v3468_v38  ;;  %v682_v40 = vpop.f32.mrf.mxu2  ;;  %v706_v44 = vpop.f32.mrf.mxu3  ;;  %1862 = vmatpush.bf16.msrb.mxu0 %v2698_v60  ;;  %v3002_v60 = vld [vmem:[#allocation6 + $0x3cc] sm:$0xf] }
 0x1b2   : > { %v683_v5 = vadd.f32 %v682_v40, %v3483_v41  ;;  %v707_v9 = vadd.f32 %v706_v44, %v3501_v17  ;;  %1810 = vmatpush.bf16.msra.mxu2 %v2346_v25  ;;  %v2745_v40 = vld [vmem:[#allocation6 + $0x328] sm:$0xf]  ;;  %v2984_v44 = vld [vmem:[#allocation6 + $0x334] sm:$0xf0] }
 0x1b3   : > { %v2746_v47 = vor.u32 %v2984_v44, %v2745_v40  ;;  %v2960_v25 = vld [vmem:[#allocation6 + $0x274] sm:$0xf0]  ;;  %v2633_v40 = vld [vmem:[#allocation6 + $0x248] sm:$0xf] }
 0x1b4   : > { %v770_v18 = vmax.f32 %v683_v5, 0.0  ;;  %v763_v21 = vmax.f32 %v707_v9, 0.0  ;;  %v2538_v5 = vor.u32 %v2932_v3, %v2537_v1  ;;  %v2521_v9 = vld [vmem:[#allocation6 + $0x168] sm:$0xf]  ;;  %v2956_v44 = vld [vmem:[#allocation6 + $0x254] sm:$0xf0] }
 0x1b5   : > { %v2894_v3 = vld [vmem:[#allocation6 + $0x6c] sm:$0xf] }
 0x1b6   : > { %1835 = vmatpush.bf16.msra.mxu3 %v2538_v5  ;;  %v2617_v5 = vld [vmem:[#allocation6 + $0x228] sm:$0xf] }
 0x1b9   : > { %v684_v34 = vpop.f32.mrf.mxu2  ;;  %v708_v10 = vpop.f32.mrf.mxu3 }
 0x1ba   : > { %v685_v14 = vadd.f32 %v684_v34, %v3483_v41  ;;  %v709_v15 = vadd.f32 %v708_v10, %v3501_v17  ;;  %v2762_v41 = vor.u32 %v2988_v27, %v2761_v26  ;;  %v2928_v34 = vld [vmem:[#allocation6 + $0x174] sm:$0xf0]  ;;  %v2665_v10 = vld [vmem:[#allocation6 + $0x288] sm:$0xf]  ;;  %v2906_v27 = vld [vmem:[#allocation6 + $0xcc] sm:$0xf] }
 0x1bb   : > { %1787 = vmatmul.bf16.gmra.mxu1 %v3474_v2  ;;  %v2522_v11 = vor.u32 %v2928_v34, %v2521_v9 }
 0x1bc   : > { %v774_v22 = vmax.f32 %v685_v14, 0.0  ;;  %v767_v23 = vmax.f32 %v709_v15, 0.0  ;;  %1895 = vmatpush.bf16.msra.mxu1 %v2762_v41  ;;  %v2666_v14 = vor.u32 %v2964_v12, %v2665_v10  ;;  %v2910_v15 = vld [vmem:[#allocation6 + $0xec] sm:$0xf]  ;;  %v2443_v41 = vld [vmem:[#allocation6 + $0xd8] sm:$0xf0] }
 0x1bd   : > { %1836 = vmatpush.bf16.msra.mxu3 %v2522_v11  ;;  %v2811_v10 = vld [vmem:[#allocation6 + $0x3b8] sm:$0xf0] }
 0x1be   : > { %v3535_v28 = vpack.c.bf16 %v774_v22, %v770_v18  ;;  %v3537_v29 = vpack.c.bf16 %v767_v23, %v763_v21  ;;  %v2462_v18 = vor.u32 %v2910_v15, %v2459_v16  ;;  %v2924_v21 = vld [vmem:[#allocation6 + $0x154] sm:$0xf0]  ;;  %v2649_v22 = vld [vmem:[#allocation6 + $0x268] sm:$0xf]  ;;  %v2379_v15 = vld [vmem:[#allocation6 + $0x58] sm:$0xf0] }
 0x1bf   : > { %v2506_v23 = vor.u32 %v2924_v21, %v2505_v20  ;;  %v2650_v26 = vor.u32 %v2960_v25, %v2649_v22  ;;  %v2994_v16 = vld [vmem:[#allocation6 + $0x38c] sm:$0xf]  ;;  %v2363_v25 = vld [vmem:[#allocation6 + $0x38] sm:$0xf0] }
 0x1c0   : > { %1623 = vmatmul.bf16.gmra.mxu3 %v3535_v28  ;;  %1647 = vmatmul.bf16.gmra.mxu0 %v3537_v29 }
 0x1c1   : > { %1705 = vmatmul.bf16.gmra.mxu2 %v3478_v24  ;;  %v711_v30 = vpop.f32.mrf.mxu3  ;;  %1896 = vmatpush.bf16.msra.mxu1 %v2746_v47  ;;  %v2634_v47 = vor.u32 %v2956_v44, %v2633_v40  ;;  %v2782_v44 = vor.u32 %v2990_v36, %v2779_v37 }
 0x1c2   : > { %v712_v55 = vadd.f32 %v711_v30, %v3501_v17  ;;  %1919 = vmatpush.bf16.msrb.mxu2 %v2462_v18  ;;  %1837 = vmatpush.bf16.msra.mxu3 %v2506_v23  ;;  %v2446_v30 = vor.u32 %v2906_v27, %v2443_v41  ;;  %v2795_v18 = vld [vmem:[#allocation6 + $0x398] sm:$0xf0]  ;;  %v2886_v23 = vld [vmem:[#allocation6 + $0x2c] sm:$0xf]  ;;  %v2948_v27 = vld [vmem:[#allocation6 + $0x214] sm:$0xf0] }
 0x1c3   : > { %v2798_v21 = vor.u32 %v2994_v16, %v2795_v18  ;;  %v2942_v41 = vld [vmem:[#allocation6 + $0x1ec] sm:$0xf]  ;;  %v2366_v40 = vor.u32 %v2886_v23, %v2363_v25  ;;  %v2699_v16 = vld [vmem:[#allocation6 + $0x2d8] sm:$0xf0] }
 0x1c4   : > { %v771_v62 = vmax.f32 %v712_v55, 0.0  ;;  %v2916_v55 = vld [vmem:[#allocation6 + $0x114] sm:$0xf0]  ;;  %v2930_v25 = vld [vmem:[#allocation6 + $0x18c] sm:$0xf] }
 0x1c5   : > { %1897 = vmatpush.bf16.msra.mxu1 %v2730_v50  ;;  %v2843_v50 = vld [vmem:[#allocation6 + $0x3f8] sm:$0xf0]  ;;  %v2474_v57 = vor.u32 %v2916_v55, %v2473_v53 }
 0x1c6   : > { %1920 = vmatpush.bf16.msrb.mxu2 %v2446_v30  ;;  %1838 = vmatpush.bf16.msra.mxu3 %v2490_v39  ;;  %v2846_v51 = vor.u32 %v3006_v49, %v2843_v50  ;;  %v2590_v39 = vor.u32 %v2942_v41, %v2587_v54  ;;  %v2986_v49 = vld [vmem:[#allocation6 + $0x34c] sm:$0xf]  ;;  %v2763_v50 = vld [vmem:[#allocation6 + $0x358] sm:$0xf0] }
 0x1c7   : > { %v2766_v53 = vor.u32 %v2986_v49, %v2763_v50  ;;  %v2683_v54 = vld [vmem:[#allocation6 + $0x2b8] sm:$0xf0]  ;;  %v2962_v49 = vld [vmem:[#allocation6 + $0x28c] sm:$0xf] }
 0x1c9   : > { %v713_v58 = vpop.f32.mrf.mxu3  ;;  %2006 = vmatpush.bf16.msrb.mxu1 %v2846_v51 }
 0x1ca   : > { %v714_v61 = vadd.f32 %v713_v58, %v3501_v17  ;;  %v2682_v17 = vor.u32 %v2968_v8, %v2681_v4  ;;  %1921 = vmatpush.bf16.msrb.mxu2 %v2430_v48  ;;  %v2411_v58 = vld [vmem:[#allocation6 + $0x98] sm:$0xf0]  ;;  %1839 = vmatpush.bf16.msra.mxu3 %v2474_v57  ;;  %v2952_v8 = vld [vmem:[#allocation6 + $0x234] sm:$0xf0] }
 0x1cb   : > { %1792 = vmatmul.bf16.gmra.mxu1 %v3488_v59  ;;  %v2395_v4 = vld [vmem:[#allocation6 + $0x78] sm:$0xf0]  ;;  %v2618_v9 = vor.u32 %v2952_v8, %v2617_v5  ;;  %v2978_v8 = vld [vmem:[#allocation6 + $0x30c] sm:$0xf] }
 0x1cc   : > { %v775_v63 = vmax.f32 %v714_v61, 0.0  ;;  %1863 = vmatpush.bf16.msrb.mxu0 %v2682_v17  ;;  %v2827_v61 = vld [vmem:[#allocation6 + $0x3d8] sm:$0xf0]  ;;  %v2998_v17 = vld [vmem:[#allocation6 + $0x3ac] sm:$0xf]  ;;  %v2398_v34 = vor.u32 %v2894_v3, %v2395_v4 }
 0x1cd   : > { %v2814_v12 = vor.u32 %v2998_v17, %v2811_v10  ;;  %v2347_v48 = vld [vmem:[#allocation6 + $0x18] sm:$0xf0] }
 0x1ce   : > { %v3545_v0 = vpack.c.bf16 %v775_v63, %v771_v62  ;;  %v2414_v62 = vor.u32 %v2898_v56, %v2411_v58  ;;  %v2830_v63 = vor.u32 %v3002_v60, %v2827_v61  ;;  %v2938_v56 = vld [vmem:[#allocation6 + $0x1cc] sm:$0xf]  ;;  %v2571_v57 = vld [vmem:[#allocation6 + $0x1d8] sm:$0xf0] }
 0x1cf   : > { %v2974_v58 = vld [vmem:[#allocation6 + $0x2ec] sm:$0xf]  ;;  %v2574_v60 = vor.u32 %v2938_v56, %v2571_v57  ;;  %v2715_v61 = vld [vmem:[#allocation6 + $0x2f8] sm:$0xf0] }
 0x1d0   : > { %1652 = vmatmul.bf16.gmra.mxu0 %v3545_v0  ;;  %1724 = vmatmul.bf16.vlgmr.msrb.gmra.mxu3 %v3495_v7  ;;  %v2718_v4 = vor.u32 %v2974_v58, %v2715_v61  ;;  %v2731_v17 = vld [vmem:[#allocation6 + $0x318] sm:$0xf0] }
 0x1d1   : > { %1710 = vmatmul.bf16.gmra.mxu2 %v3493_v6  ;;  %1864 = vmatpush.bf16.msrb.mxu0 %v2666_v14  ;;  %v2890_v14 = vld [vmem:[#allocation6 + $0x4c] sm:$0xf]  ;;  %v2555_v10 = vld [vmem:[#allocation6 + $0x1b8] sm:$0xf0] }
 0x1d2   : > { %2007 = vmatpush.bf16.msrb.mxu1 %v2830_v63  ;;  %1922 = vmatpush.bf16.msrb.mxu2 %v2414_v62  ;;  %v2382_v20 = vor.u32 %v2890_v14, %v2379_v15  ;;  %v2982_v62 = vld [vmem:[#allocation6 + $0x32c] sm:$0xf]  ;;  %v2747_v63 = vld [vmem:[#allocation6 + $0x338] sm:$0xf0] }
 0x1d3   : > { %1948 = vmatpush.bf16.msrb.mxu3 %v2590_v39  ;;  %v2750_v5 = vor.u32 %v2982_v62, %v2747_v63 }
 0x1d5   : > { %1865 = vmatpush.bf16.msrb.mxu0 %v2650_v26  ;;  %v2601_v26 = vld [vmem:[#allocation6 + $0x208] sm:$0xf] }
 0x1d6   : > { %2008 = vmatpush.bf16.msrb.mxu1 %v2814_v12  ;;  %1923 = vmatpush.bf16.msrb.mxu2 %v2398_v34  ;;  %v2602_v30 = vor.u32 %v2948_v27, %v2601_v26  ;;  %v2934_v34 = vld [vmem:[#allocation6 + $0x1ac] sm:$0xf]  ;;  %v2539_v26 = vld [vmem:[#allocation6 + $0x198] sm:$0xf0] }
 0x1d7   : > { %1949 = vmatpush.bf16.msrb.mxu3 %v2574_v60  ;;  %v2970_v12 = vld [vmem:[#allocation6 + $0x2cc] sm:$0xf]  ;;  %v2558_v15 = vor.u32 %v2934_v34, %v2555_v10 }
 0x1d8   : > { %v2702_v18 = vor.u32 %v2970_v12, %v2699_v16  ;;  %v2966_v27 = vld [vmem:[#allocation6 + $0x2ac] sm:$0xf] }
 0x1d9   : > { %1866 = vmatpush.bf16.msrb.mxu0 %v2634_v47  ;;  %v2882_v47 = vld [vmem:[#allocation6 + $0xc] sm:$0xf]  ;;  %v2686_v39 = vor.u32 %v2966_v27, %v2683_v54 }
 0x1da   : > { %2009 = vmatpush.bf16.msrb.mxu1 %v2798_v21  ;;  %1924 = vmatpush.bf16.msrb.mxu2 %v2382_v20  ;;  %v2350_v51 = vor.u32 %v2882_v47, %v2347_v48  ;;  %v3585_v20 = vld [vmem:[%s3806_s5] sm:$0xf]  ;;  %v2926_v47 = vld [vmem:[#allocation6 + $0x16c] sm:$0xf]  ;;  %v2523_v48 = vld [vmem:[#allocation6 + $0x178] sm:$0xf0] }
 0x1db   : > { %1797 = vmatmul.bf16.gmra.mxu1 %v3506_v32  ;;  %1950 = vmatpush.bf16.msrb.mxu3 %v2558_v15  ;;  %v3591_v23 = vperm.slane %v3585_v20, 0  ;;  %v2526_v50 = vor.u32 %v2926_v47, %v2523_v48  ;;  %v2954_v27 = vld [vmem:[#allocation6 + $0x24c] sm:$0xf] }
 0x1dd   : > { %v3553_v19 = vpop.f32.mrf.mxu2  ;;  %1867 = vmatpush.bf16.msrb.mxu0 %v2618_v9  ;;  %v2734_v9 = vor.u32 %v2978_v8, %v2731_v17 }
 0x1de   : > { %2010 = vmatpush.bf16.msrb.mxu1 %v2782_v44  ;;  %1925 = vmatpush.bf16.msrb.mxu2 %v2366_v40  ;;  %v1581_v41 = vadd.f32 %v3553_v19, %v3591_v23 }
 0x1e0   : > { %1729 = vmatmul.bf16.gmra.mxu3 %v3511_v42  ;;  %1753 = vmatmul.bf16.vlgmr.msra.gmra.mxu0 %v3513_v43 }
 0x1e1   : > { %1811 = vmatmul.bf16.vlgmr.msra.gmra.mxu2 %v3455_v46  ;;  %1868 = vmatpush.bf16.msrb.mxu0 %v2602_v30  ;;  %v2542_v30 = vor.u32 %v2930_v25, %v2539_v26  ;;  %v2491_v25 = vld [vmem:[#allocation6 + $0x138] sm:$0xf0] }
 0x1e2   : > { %2011 = vmatpush.bf16.msrb.mxu1 %v2766_v53  ;;  %1926 = vmatpush.bf16.msrb.mxu2 %v2350_v51  ;;  %v2667_v51 = vld [vmem:[#allocation6 + $0x298] sm:$0xf0] }
 0x1e3   : > { %1951 = vmatpush.bf16.msrb.mxu3 %v2542_v30  ;;  %v2670_v19 = vor.u32 %v2962_v49, %v2667_v51  ;;  %v2619_v51 = vld [vmem:[#allocation6 + $0x238] sm:$0xf0] }
 0x1e5   : > { %v3558_v52 = vpop.f32.mrf.mxu2  ;;  %1977 = vmatpush.bf16.msra.mxu0 %v2718_v4  ;;  %v2507_v4 = vld [vmem:[#allocation6 + $0x158] sm:$0xf0] }
 0x1e6   : > { %2012 = vmatpush.bf16.msrb.mxu1 %v2750_v5  ;;  %v1583_v53 = vadd.f32 %v3558_v52, %v3591_v23  ;;  %v2922_v52 = vld [vmem:[#allocation6 + $0x14c] sm:$0xf] }
 0x1e7   : > { %v3556_v31 = vpop.f32.mrf.mxu1  ;;  %1952 = vmatpush.bf16.msrb.mxu3 %v2526_v50  ;;  %v2958_v5 = vld [vmem:[#allocation6 + $0x26c] sm:$0xf]  ;;  %v2510_v17 = vor.u32 %v2922_v52, %v2507_v4 }
 0x1e8   : > { %v2946_v4 = vld [vmem:[#allocation6 + $0x20c] sm:$0xf] }
 0x1e9   : > { %1978 = vmatpush.bf16.msra.mxu0 %v2702_v18  ;;  %v2918_v18 = vld [vmem:[#allocation6 + $0x12c] sm:$0xf] }
 0x1ea   : > { %2013 = vmatpush.bf16.msrb.mxu1 %v2734_v9  ;;  %v2651_v9 = vld [vmem:[#allocation6 + $0x278] sm:$0xf0]  ;;  %v2494_v26 = vor.u32 %v2918_v18, %v2491_v25 }
 0x1eb   : > { %1898 = vmatmul.bf16.vlgmr.msra.gmra.mxu1 %v3464_v13  ;;  %v2654_v10 = vor.u32 %v2958_v5, %v2651_v9  ;;  %1953 = vmatpush.bf16.msrb.mxu3 %v2510_v17  ;;  %v2603_v5 = vld [vmem:[#allocation6 + $0x218] sm:$0xf0] }
 0x1ed   : > { %1979 = vmatpush.bf16.msra.mxu0 %v2686_v39  ;;  %v2914_v39 = vld [vmem:[#allocation6 + $0x10c] sm:$0xf] }
 0x1ef   : > { %v3561_v1 = vpop.f32.mrf.mxu1  ;;  %1954 = vmatpush.bf16.msrb.mxu3 %v2494_v26 }
 0x1f0   : > { %1734 = vmatmul.bf16.gmra.mxu3 %v3523_v33  ;;  %1758 = vmatmul.bf16.gmra.mxu0 %v3525_v35 }
 0x1f1   : > { %1816 = vmatmul.bf16.gmra.mxu2 %v3468_v38  ;;  %1980 = vmatpush.bf16.msra.mxu0 %v2670_v19 }
 0x1f3   : > { %v3566_v11 = vpop.f32.mrf.mxu2 }
 0x1f4   : > { %v1586_v8 = vadd.f32 %v3566_v11, %v3591_v23 }
 0x1f5   : > { %1981 = vmatpush.bf16.msra.mxu0 %v2654_v10 }
 0x1f7   : > { %v3568_v22 = vpop.f32.mrf.mxu1 }
 0x1fb   : > { %1903 = vmatmul.bf16.gmra.mxu1 %v3474_v2  ;;  %v3571_v45 = vpop.f32.mrf.mxu2 }
 0x1fc   : > { %v1588_v54 = vadd.f32 %v3571_v45, %v3591_v23 }
 0x1ff   : > { %v3573_v55 = vpop.f32.mrf.mxu1 }
 0x200   : > { %1739 = vmatmul.bf16.gmra.mxu3 %v3535_v28  ;;  %1763 = vmatmul.bf16.gmra.mxu0 %v3537_v29 }
 0x201   : > { %1821 = vmatmul.bf16.gmra.mxu2 %v3478_v24 }
 0x203   : > { %v3578_v3 = vpop.f32.mrf.mxu2 }
 0x208   : > { %v3580_v14 = vpop.f32.mrf.mxu1 }
 0x20b   : > { %1908 = vmatmul.bf16.gmra.mxu1 %v3488_v59  ;;  %v3588_v21 = vpop.f32.mrf.mxu2 }
 0x210   : > { %1768 = vmatmul.bf16.gmra.mxu0 %v3545_v0  ;;  %1840 = vmatmul.bf16.vlgmr.msra.gmra.mxu3 %v3495_v7  ;;  %v3598_v36 = vpop.f32.mrf.mxu1 }
 0x211   : > { %1826 = vmatmul.bf16.gmra.mxu2 %v3493_v6 }
 0x213   : > { %v1609_v37 = vpop.f32.mrf.mxu3  ;;  %v3600_v44 = vpop.f32.mrf.mxu2 }
 0x214   : > { %v1610_v40 = vadd.f32 %v1609_v37, %v1581_v41  ;;  %v2635_v41 = vld [vmem:[#allocation6 + $0x258] sm:$0xf0] }
 0x215   : > { %v2638_v30 = vor.u32 %v2954_v27, %v2635_v41 }
 0x217   : > { %1982 = vmatpush.bf16.msra.mxu0 %v2638_v30 }
 0x218   : > { %v3605_v58 = vpop.f32.mrf.mxu1 }
 0x21b   : > { %1913 = vmatmul.bf16.gmra.mxu1 %v3506_v32  ;;  %v1611_v56 = vpop.f32.mrf.mxu3  ;;  %v3607_v62 = vpop.f32.mrf.mxu2 }
 0x21c   : > { %v1612_v57 = vadd.f32 %v1611_v56, %v1583_v53  ;;  %v1591_v53 = vadd.f32 %v3578_v3, %v3591_v23 }
 0x21d   : > { %v1638_v60 = vpop.f32.mrf.mxu0 }
 0x21e   : > { %v1639_v61 = vadd.f32 %v1638_v60, %v1610_v40  ;;  %v2475_v40 = vld [vmem:[#allocation6 + $0x118] sm:$0xf0] }
 0x21f   : > { %v2478_v48 = vor.u32 %v2914_v39, %v2475_v40 }
 0x220   : > { %v3610_v63 = vadd.f32 %v3556_v31, %v1639_v61  ;;  %1845 = vmatmul.bf16.gmra.mxu3 %v3511_v42  ;;  %1869 = vmatmul.bf16.vlgmr.msrb.gmra.mxu0 %v3513_v43  ;;  %v3617_v16 = vpop.f32.mrf.mxu1 }
 0x221   : > { %1927 = vmatmul.bf16.vlgmr.msrb.gmra.mxu2 %v3455_v46  ;;  %1955 = vmatpush.bf16.msrb.mxu3 %v2478_v48 }
 0x223   : > { %v1614_v34 = vpop.f32.mrf.mxu3 }
 0x224   : > { %v1615_v12 = vadd.f32 %v1614_v34, %v1586_v8  ;;  %v3622_v11 = vpop.f32.mrf.mxu2  ;;  %v2606_v8 = vor.u32 %v2946_v4, %v2603_v5 }
 0x225   : > { %v1640_v31 = vpop.f32.mrf.mxu0 }
 0x226   : > { %v1641_v15 = vadd.f32 %v1640_v31, %v1612_v57 }
 0x228   : > { %v3620_v46 = vadd.f32 %v3561_v1, %v1641_v15  ;;  %v3632_v45 = vpop.f32.mrf.mxu1 }
 0x22b   : > { %2014 = vmatmul.bf16.vlgmr.msrb.gmra.mxu1 %v3464_v13  ;;  %v1616_v37 = vpop.f32.mrf.mxu3  ;;  %v2950_v13 = vld [vmem:[#allocation6 + $0x22c] sm:$0xf] }
 0x22c   : > { %v1617_v47 = vadd.f32 %v1616_v37, %v1588_v54  ;;  %v2622_v19 = vor.u32 %v2950_v13, %v2619_v51  ;;  %v1698_v56 = vpop.f32.mrf.mxu2 }
 0x22d   : > { %v1643_v1 = vpop.f32.mrf.mxu0 }
 0x22e   : > { %v1644_v49 = vadd.f32 %v1643_v1, %v1615_v12  ;;  %1983 = vmatpush.bf16.msra.mxu0 %v2622_v19 }
 0x230   : > { %v3628_v50 = vadd.f32 %v3568_v22, %v1644_v49  ;;  %1850 = vmatmul.bf16.gmra.mxu3 %v3523_v33  ;;  %1874 = vmatmul.bf16.gmra.mxu0 %v3525_v35  ;;  %v1785_v17 = vpop.f32.mrf.mxu1 }
 0x231   : > { %1932 = vmatmul.bf16.gmra.mxu2 %v3468_v38  ;;  %v1593_v38 = vadd.f32 %v3588_v21, %v3591_v23 }
 0x232   : > { %1984 = vmatpush.bf16.msra.mxu0 %v2606_v8 }
 0x233   : > { %v1619_v57 = vpop.f32.mrf.mxu3 }
 0x234   : > { %v1620_v60 = vadd.f32 %v1619_v57, %v1591_v53  ;;  %v1701_v34 = vpop.f32.mrf.mxu2 }
 0x235   : > { %v1645_v22 = vpop.f32.mrf.mxu0 }
 0x236   : > { %v1646_v61 = vadd.f32 %v1645_v22, %v1617_v47 }
 0x238   : > { %v3638_v52 = vadd.f32 %v3573_v55, %v1646_v61  ;;  %v1596_v55 = vadd.f32 %v3600_v44, %v3591_v23  ;;  %v1788_v15 = vpop.f32.mrf.mxu1 }
 0x23b   : > { %2019 = vmatmul.bf16.gmra.mxu1 %v3474_v2  ;;  %v1621_v3 = vpop.f32.mrf.mxu3 }
 0x23c   : > { %v1622_v9 = vadd.f32 %v1621_v3, %v1593_v38  ;;  %v1703_v26 = vpop.f32.mrf.mxu2 }
 0x23d   : > { %v1648_v10 = vpop.f32.mrf.mxu0 }
 0x23e   : > { %v1649_v12 = vadd.f32 %v1648_v10, %v1620_v60 }
 0x240   : > { %v3644_v31 = vadd.f32 %v3580_v14, %v1649_v12  ;;  %1855 = vmatmul.bf16.gmra.mxu3 %v3535_v28  ;;  %1879 = vmatmul.bf16.gmra.mxu0 %v3537_v29  ;;  %v1598_v14 = vadd.f32 %v3607_v62, %v3591_v23  ;;  %v1790_v37 = vpop.f32.mrf.mxu1 }
 0x241   : > { %1937 = vmatmul.bf16.gmra.mxu2 %v3478_v24 }
 0x243   : > { %v1624_v21 = vpop.f32.mrf.mxu3 }
 0x244   : > { %v1625_v2 = vadd.f32 %v1624_v21, %v1596_v55 }
 0x245   : > { %v1650_v18 = vpop.f32.mrf.mxu0 }
 0x246   : > { %v1651_v25 = vadd.f32 %v1650_v18, %v1622_v9 }
 0x248   : > { %v3652_v27 = vadd.f32 %v3598_v36, %v1651_v25  ;;  %v1706_v36 = vpop.f32.mrf.mxu2  ;;  %v1793_v47 = vpop.f32.mrf.mxu1 }
 0x24b   : > { %2024 = vmatmul.bf16.gmra.mxu1 %v3488_v59  ;;  %v1626_v41 = vpop.f32.mrf.mxu3  ;;  %v3664_v59 = vperm.slane %v3585_v20, 1 }
 0x24c   : > { %v1627_v30 = vadd.f32 %v1626_v41, %v1598_v14 }
 0x24d   : > { %v1653_v24 = vpop.f32.mrf.mxu0  ;;  %v1704_v38 = vadd.f32 %v1703_v26, %v3664_v59  ;;  %v1707_v21 = vadd.f32 %v1706_v36, %v3664_v59 }
 0x24e   : > { %v1654_v54 = vadd.f32 %v1653_v24, %v1625_v2 }
 0x250   : > { %v3658_v44 = vadd.f32 %v3605_v58, %v1654_v54  ;;  %1884 = vmatmul.bf16.gmra.mxu0 %v3545_v0  ;;  %1956 = vmatmul.bf16.vlgmr.msrb.gmra.mxu3 %v3495_v7  ;;  %v1697_v58 = vadd.f32 %v3622_v11, %v3664_v59  ;;  %v1708_v48 = vpop.f32.mrf.mxu2  ;;  %v1795_v51 = vpop.f32.mrf.mxu1 }
 0x251   : > { %1942 = vmatmul.bf16.gmra.mxu2 %v3493_v6  ;;  %v1709_v26 = vadd.f32 %v1708_v48, %v3664_v59 }
 0x253   : > { %v1725_v23 = vpop.f32.mrf.mxu3 }
 0x254   : > { %v1726_v1 = vadd.f32 %v1725_v23, %v1697_v58 }
 0x255   : > { %v1655_v62 = vpop.f32.mrf.mxu0 }
 0x256   : > { %v1656_v39 = vadd.f32 %v1655_v62, %v1627_v30 }
 0x258   : > { %v3667_v40 = vadd.f32 %v3617_v16, %v1656_v39  ;;  %v1699_v16 = vadd.f32 %v1698_v56, %v3664_v59  ;;  %v1711_v19 = vpop.f32.mrf.mxu2 }
 0x259   : > { %v1712_v36 = vadd.f32 %v1711_v19, %v3664_v59 }
 0x25b   : > { %2029 = vmatmul.bf16.gmra.mxu1 %v3506_v32  ;;  %v1727_v7 = vpop.f32.mrf.mxu3 }
 0x25c   : > { %v1728_v32 = vadd.f32 %v1727_v7, %v1699_v16 }
 0x25d   : > { %v1754_v6 = vpop.f32.mrf.mxu0 }
 0x25e   : > { %v1755_v49 = vadd.f32 %v1754_v6, %v1726_v1 }
 0x260   : > { %v1784_v13 = vadd.f32 %v3632_v45, %v1755_v49  ;;  %1961 = vmatmul.bf16.gmra.mxu3 %v3511_v42  ;;  %1985 = vmatmul.bf16.vlgmr.msra.gmra.mxu0 %v3513_v43  ;;  %v1702_v42 = vadd.f32 %v1701_v34, %v3664_v59  ;;  %v1713_v5 = vpop.f32.mrf.mxu2 }
 0x261   : > { %v1714_v7 = vadd.f32 %v1713_v5, %v3664_v59 }
 0x262   : > { %v2035_v11 = vpack.c.bf16 %v1784_v13, %v3610_v63  ;;  %v1798_v63 = vpop.f32.mrf.mxu1 }
 0x263   : > { %v1730_v53 = vpop.f32.mrf.mxu3 }
 0x264   : > { %2051 = vst [vmem:[%s3680_s8] sm:$0xff] %v2035_v11  ;;  %v1731_v22 = vadd.f32 %v1730_v53, %v1702_v42 }
 0x265   : > { %v1756_v57 = vpop.f32.mrf.mxu0 }
 0x266   : > { %v1757_v60 = vadd.f32 %v1756_v57, %v1728_v32 }
 0x268   : > { %v1786_v45 = vadd.f32 %v1785_v17, %v1757_v60  ;;  %v1812_v55 = vpop.f32.mrf.mxu2 }
 0x26a   : > { %v2037_v43 = vpack.c.bf16 %v1786_v45, %v3620_v46  ;;  %v1800_v10 = vpop.f32.mrf.mxu1 }
 0x26b   : > { %v1732_v56 = vpop.f32.mrf.mxu3 }
 0x26c   : > { %2053 = vst [vmem:[%s3680_s8 + $0x10] sm:$0xff] %v2037_v43  ;;  %v1733_v9 = vadd.f32 %v1732_v56, %v1704_v38 }
 0x26d   : > { %v1759_v61 = vpop.f32.mrf.mxu0 }
 0x26e   : > { %v1760_v4 = vadd.f32 %v1759_v61, %v1731_v22 }
 0x270   : > { %v1789_v8 = vadd.f32 %v1788_v15, %v1760_v4  ;;  %1966 = vmatmul.bf16.gmra.mxu3 %v3523_v33  ;;  %1990 = vmatmul.bf16.gmra.mxu0 %v3525_v35  ;;  %v1814_v41 = vpop.f32.mrf.mxu2 }
 0x272   : > { %v2039_v17 = vpack.c.bf16 %v1789_v8, %v3628_v50  ;;  %v1899_v50 = vpop.f32.mrf.mxu1 }
 0x273   : > { %v1735_v3 = vpop.f32.mrf.mxu3 }
 0x274   : > { %2055 = vst [vmem:[%s3680_s8 + $0x20] sm:$0xff] %v2039_v17  ;;  %v1736_v15 = vadd.f32 %v1735_v3, %v1707_v21 }
 0x275   : > { %v1761_v46 = vpop.f32.mrf.mxu0 }
 0x276   : > { %v1762_v34 = vadd.f32 %v1761_v46, %v1733_v9 }
 0x278   : > { %v1791_v12 = vadd.f32 %v1790_v37, %v1762_v34  ;;  %v1817_v39 = vpop.f32.mrf.mxu2 }
 0x27a   : > { %v2041_v33 = vpack.c.bf16 %v1791_v12, %v3638_v52 }
 0x27b   : > { %v1737_v2 = vpop.f32.mrf.mxu3 }
 0x27c   : > { %2057 = vst [vmem:[%s3680_s8 + $0x30] sm:$0xff] %v2041_v33  ;;  %v1738_v24 = vadd.f32 %v1737_v2, %v1709_v26 }
 0x27d   : > { %v1764_v35 = vpop.f32.mrf.mxu0 }
 0x27e   : > { %v1765_v18 = vadd.f32 %v1764_v35, %v1736_v15 }
 0x280   : > { %v1794_v25 = vadd.f32 %v1793_v47, %v1765_v18  ;;  %1971 = vmatmul.bf16.gmra.mxu3 %v3535_v28  ;;  %1995 = vmatmul.bf16.gmra.mxu0 %v3537_v29  ;;  %v1901_v28 = vpop.f32.mrf.mxu1  ;;  %v1819_v53 = vpop.f32.mrf.mxu2 }
 0x282   : > { %v2043_v14 = vpack.c.bf16 %v1794_v25, %v3644_v31  ;;  %v3703_v31 = vperm.slane %v3585_v20, 2 }
 0x283   : > { %v1740_v30 = vpop.f32.mrf.mxu3 }
 0x284   : > { %2059 = vst [vmem:[%s3680_s8 + $0x40] sm:$0xff] %v2043_v14  ;;  %v1741_v62 = vadd.f32 %v1740_v30, %v1712_v36  ;;  %v1813_v1 = vadd.f32 %v1812_v55, %v3703_v31  ;;  %v1815_v19 = vadd.f32 %v1814_v41, %v3703_v31  ;;  %v1818_v56 = vadd.f32 %v1817_v39, %v3703_v31 }
 0x285   : > { %v1766_v52 = vpop.f32.mrf.mxu0 }
 0x286   : > { %v1767_v54 = vadd.f32 %v1766_v52, %v1738_v24 }
 0x288   : > { %v1796_v37 = vadd.f32 %v1795_v51, %v1767_v54  ;;  %v1904_v16 = vpop.f32.mrf.mxu1  ;;  %v1822_v43 = vpop.f32.mrf.mxu2 }
 0x28a   : > { %v2045_v23 = vpack.c.bf16 %v1796_v37, %v3652_v27 }
 0x28b   : > { %v1742_v29 = vpop.f32.mrf.mxu3 }
 0x28c   : > { %2061 = vst [vmem:[%s3680_s8 + $0x50] sm:$0xff] %v2045_v23  ;;  %v1743_v49 = vadd.f32 %v1742_v29, %v1714_v7 }
 0x28d   : > { %v1769_v47 = vpop.f32.mrf.mxu0 }
 0x28e   : > { %v1770_v58 = vadd.f32 %v1769_v47, %v1741_v62 }
 0x290   : > { %v1799_v48 = vadd.f32 %v1798_v63, %v1770_v58  ;;  %2000 = vmatmul.bf16.gmra.mxu0 %v3545_v0  ;;  %v1906_v42 = vpop.f32.mrf.mxu1  ;;  %v1824_v38 = vpop.f32.mrf.mxu2 }
 0x291   : > { %v1825_v18 = vadd.f32 %v1824_v38, %v3703_v31 }
 0x292   : > { %v2047_v27 = vpack.c.bf16 %v1799_v48, %v3658_v44 }
 0x293   : > { %v1841_v6 = vpop.f32.mrf.mxu3 }
 0x294   : > { %2063 = vst [vmem:[%s3680_s8 + $0x60] sm:$0xff] %v2047_v27  ;;  %v1842_v13 = vadd.f32 %v1841_v6, %v1813_v1 }
 0x295   : > { %v1771_v11 = vpop.f32.mrf.mxu0 }
 0x296   : > { %v1772_v51 = vadd.f32 %v1771_v11, %v1743_v49 }
 0x298   : > { %v1801_v32 = vadd.f32 %v1800_v10, %v1772_v51  ;;  %v1909_v8 = vpop.f32.mrf.mxu1  ;;  %v1823_v10 = vadd.f32 %v1822_v43, %v3703_v31  ;;  %v1827_v33 = vpop.f32.mrf.mxu2 }
 0x299   : > { %v1828_v52 = vadd.f32 %v1827_v33, %v3703_v31 }
 0x29a   : > { %v2049_v0 = vpack.c.bf16 %v1801_v32, %v3667_v40  ;;  %v1820_v40 = vadd.f32 %v1819_v53, %v3703_v31 }
 0x29b   : > { %v1843_v57 = vpop.f32.mrf.mxu3 }
 0x29c   : > { %2065 = vst [vmem:[%s3680_s8 + $0x70] sm:$0xff] %v2049_v0  ;;  %v1844_v59 = vadd.f32 %v1843_v57, %v1815_v19 }
 0x29d   : > { %v1870_v60 = vpop.f32.mrf.mxu0 }
 0x29e   : > { %v1871_v45 = vadd.f32 %v1870_v60, %v1842_v13 }
 0x2a0   : > { %v3713_v44 = vadd.f32 %v1899_v50, %v1871_v45  ;;  %v1911_v12 = vpop.f32.mrf.mxu1  ;;  %v1829_v30 = vpop.f32.mrf.mxu2 }
 0x2a1   : > { %v1830_v39 = vadd.f32 %v1829_v30, %v3703_v31 }
 0x2a3   : > { %v1846_v22 = vpop.f32.mrf.mxu3 }
 0x2a4   : > { %v1847_v63 = vadd.f32 %v1846_v22, %v1818_v56 }
 0x2a5   : > { %v1872_v61 = vpop.f32.mrf.mxu0 }
 0x2a6   : > { %v1873_v4 = vadd.f32 %v1872_v61, %v1844_v59 }
 0x2a8   : > { %v3716_v5 = vadd.f32 %v1901_v28, %v1873_v4  ;;  %v1914_v26 = vpop.f32.mrf.mxu1  ;;  %v1928_v62 = vpop.f32.mrf.mxu2 }
 0x2ab   : > { %v1848_v17 = vpop.f32.mrf.mxu3 }
 0x2ac   : > { %v1849_v3 = vadd.f32 %v1848_v17, %v1820_v40 }
 0x2ad   : > { %v1875_v9 = vpop.f32.mrf.mxu0 }
 0x2ae   : > { %v1876_v46 = vadd.f32 %v1875_v9, %v1847_v63 }
 0x2b0   : > { %v3719_v34 = vadd.f32 %v1904_v16, %v1876_v46  ;;  %v1916_v28 = vpop.f32.mrf.mxu1  ;;  %v1930_v6 = vpop.f32.mrf.mxu2  ;;  %v3734_v16 = vperm.slane %v3585_v20, 3 }
 0x2b2   : > { %v1929_v53 = vadd.f32 %v1928_v62, %v3734_v16  ;;  %v1931_v45 = vadd.f32 %v1930_v6, %v3734_v16 }
 0x2b3   : > { %v1851_v55 = vpop.f32.mrf.mxu3 }
 0x2b4   : > { %v1852_v21 = vadd.f32 %v1851_v55, %v1823_v10 }
 0x2b5   : > { %v1877_v2 = vpop.f32.mrf.mxu0 }
 0x2b6   : > { %v1878_v15 = vadd.f32 %v1877_v2, %v1849_v3 }
 0x2b8   : > { %v3722_v35 = vadd.f32 %v1906_v42, %v1878_v15  ;;  %v2015_v27 = vpop.f32.mrf.mxu1  ;;  %v1933_v0 = vpop.f32.mrf.mxu2 }
 0x2bb   : > { %v1853_v25 = vpop.f32.mrf.mxu3 }
 0x2bc   : > { %v1854_v50 = vadd.f32 %v1853_v25, %v1825_v18 }
 0x2bd   : > { %v1880_v14 = vpop.f32.mrf.mxu0 }
 0x2be   : > { %v1881_v41 = vadd.f32 %v1880_v14, %v1852_v21 }
 0x2c0   : > { %v3725_v24 = vadd.f32 %v1909_v8, %v1881_v41  ;;  %v2017_v31 = vpop.f32.mrf.mxu1  ;;  %v1935_v61 = vpop.f32.mrf.mxu2  ;;  %v1934_v8 = vadd.f32 %v1933_v0, %v3734_v16 }
 0x2c3   : > { %v1856_v54 = vpop.f32.mrf.mxu3 }
 0x2c4   : > { %v1857_v37 = vadd.f32 %v1856_v54, %v1828_v52 }
 0x2c5   : > { %v1882_v36 = vpop.f32.mrf.mxu0 }
 0x2c6   : > { %v1883_v23 = vadd.f32 %v1882_v36, %v1854_v50 }
 0x2c8   : > { %v3728_v29 = vadd.f32 %v1911_v12, %v1883_v23  ;;  %v2020_v56 = vpop.f32.mrf.mxu1  ;;  %v1938_v10 = vpop.f32.mrf.mxu2  ;;  %v1936_v12 = vadd.f32 %v1935_v61, %v3734_v16 }
 0x2c9   : > { %v1939_v25 = vadd.f32 %v1938_v10, %v3734_v16 }
 0x2cb   : > { %v1858_v47 = vpop.f32.mrf.mxu3 }
 0x2cc   : > { %v1859_v58 = vadd.f32 %v1858_v47, %v1830_v39 }
 0x2cd   : > { %v1885_v48 = vpop.f32.mrf.mxu0 }
 0x2ce   : > { %v1886_v7 = vadd.f32 %v1885_v48, %v1857_v37 }
 0x2d0   : > { %v3731_v1 = vadd.f32 %v1914_v26, %v1886_v7  ;;  %v2022_v46 = vpop.f32.mrf.mxu1  ;;  %v1940_v26 = vpop.f32.mrf.mxu2 }
 0x2d1   : > { %v1941_v54 = vadd.f32 %v1940_v26, %v3734_v16 }
 0x2d3   : > { %v1957_v49 = vpop.f32.mrf.mxu3 }
 0x2d4   : > { %v1958_v19 = vadd.f32 %v1957_v49, %v1929_v53 }
 0x2d5   : > { %v1887_v13 = vpop.f32.mrf.mxu0 }
 0x2d6   : > { %v1888_v11 = vadd.f32 %v1887_v13, %v1859_v58 }
 0x2d8   : > { %v3736_v51 = vadd.f32 %v1916_v28, %v1888_v11  ;;  %v2025_v18 = vpop.f32.mrf.mxu1  ;;  %v1943_v28 = vpop.f32.mrf.mxu2 }
 0x2d9   : > { %v1944_v58 = vadd.f32 %v1943_v28, %v3734_v16 }
 0x2db   : > { %v1959_v32 = vpop.f32.mrf.mxu3 }
 0x2dc   : > { %v1960_v20 = vadd.f32 %v1959_v32, %v1931_v45 }
 0x2dd   : > { %v1986_v57 = vpop.f32.mrf.mxu0 }
 0x2de   : > { %v1987_v59 = vadd.f32 %v1986_v57, %v1958_v19 }
 0x2e0   : > { %v2016_v60 = vadd.f32 %v2015_v27, %v1987_v59  ;;  %v2027_v36 = vpop.f32.mrf.mxu1  ;;  %v1945_v49 = vpop.f32.mrf.mxu2 }
 0x2e1   : > { %v1946_v53 = vadd.f32 %v1945_v49, %v3734_v16 }
 0x2e2   : > { %v2036_v42 = vpack.c.bf16 %v2016_v60, %v3713_v44 }
 0x2e3   : > { %v1962_v43 = vpop.f32.mrf.mxu3 }
 0x2e4   : > { %2052 = vst [vmem:[%s3680_s8 + $0x8] sm:$0xff] %v2036_v42  ;;  %v1963_v17 = vadd.f32 %v1962_v43, %v1934_v8 }
 0x2e5   : > { %v1988_v22 = vpop.f32.mrf.mxu0 }
 0x2e6   : > { %v1989_v63 = vadd.f32 %v1988_v22, %v1960_v20 }
 0x2e8   : > { %v2018_v4 = vadd.f32 %v2017_v31, %v1989_v63  ;;  %v2030_v27 = vpop.f32.mrf.mxu1 }
 0x2ea   : > { %v2038_v40 = vpack.c.bf16 %v2018_v4, %v3716_v5 }
 0x2eb   : > { %v1964_v38 = vpop.f32.mrf.mxu3 }
 0x2ec   : > { %2054 = vst [vmem:[%s3680_s8 + $0x18] sm:$0xff] %v2038_v40  ;;  %v1965_v33 = vadd.f32 %v1964_v38, %v1936_v12 }
 0x2ed   : > { %v1991_v3 = vpop.f32.mrf.mxu0 }
 0x2ee   : > { %v1992_v9 = vadd.f32 %v1991_v3, %v1963_v17 }
 0x2f0   : > { %v2021_v44 = vadd.f32 %v2020_v56, %v1992_v9  ;;  %v2032_v0 = vpop.f32.mrf.mxu1 }
 0x2f2   : > { %v2040_v55 = vpack.c.bf16 %v2021_v44, %v3719_v34 }
 0x2f3   : > { %v1967_v21 = vpop.f32.mrf.mxu3 }
 0x2f4   : > { %2056 = vst [vmem:[%s3680_s8 + $0x28] sm:$0xff] %v2040_v55  ;;  %v1968_v14 = vadd.f32 %v1967_v21, %v1939_v25 }
 0x2f5   : > { %v1993_v2 = vpop.f32.mrf.mxu0 }
 0x2f6   : > { %v1994_v15 = vadd.f32 %v1993_v2, %v1965_v33 }
 0x2f8   : > { %v2023_v5 = vadd.f32 %v2022_v46, %v1994_v15 }
 0x2fa   : > { %v2042_v50 = vpack.c.bf16 %v2023_v5, %v3722_v35 }
 0x2fb   : > { %v1969_v41 = vpop.f32.mrf.mxu3 }
 0x2fc   : > { %2058 = vst [vmem:[%s3680_s8 + $0x38] sm:$0xff] %v2042_v50  ;;  %v1970_v23 = vadd.f32 %v1969_v41, %v1941_v54 }
 0x2fd   : > { %v1996_v30 = vpop.f32.mrf.mxu0 }
 0x2fe   : > { %v1997_v52 = vadd.f32 %v1996_v30, %v1968_v14 }
 0x300   : > { %v2026_v34 = vadd.f32 %v2025_v18, %v1997_v52 }
 0x302   : > { %v2044_v37 = vpack.c.bf16 %v2026_v34, %v3725_v24 }
 0x303   : > { %v1972_v35 = vpop.f32.mrf.mxu3 }
 0x304   : > { %2060 = vst [vmem:[%s3680_s8 + $0x48] sm:$0xff] %v2044_v37  ;;  %v1973_v7 = vadd.f32 %v1972_v35, %v1944_v58 }
 0x305   : > { %v1998_v62 = vpop.f32.mrf.mxu0 }
 0x306   : > { %v1999_v39 = vadd.f32 %v1998_v62, %v1970_v23 }
 0x308   : > { %v2028_v47 = vadd.f32 %v2027_v36, %v1999_v39 }
 0x30a   : > { %v2046_v48 = vpack.c.bf16 %v2028_v47, %v3728_v29 }
 0x30b   : > { %v1974_v11 = vpop.f32.mrf.mxu3 }
 0x30c   : > { %2062 = vst [vmem:[%s3680_s8 + $0x58] sm:$0xff] %v2046_v48  ;;  %v1975_v29 = vadd.f32 %v1974_v11, %v1946_v53 }
 0x30d   : > { %v2001_v6 = vpop.f32.mrf.mxu0 }
 0x30e   : > { %v2002_v24 = vadd.f32 %v2001_v6, %v1973_v7 }
 0x310   : > { %v2031_v13 = vadd.f32 %v2030_v27, %v2002_v24 }
 0x312   : > { %v2048_v31 = vpack.c.bf16 %v2031_v13, %v3731_v1 }
 0x314   : > { %2064 = vst [vmem:[%s3680_s8 + $0x68] sm:$0xff] %v2048_v31 }
 0x315   : > { %v2003_v32 = vpop.f32.mrf.mxu0 }
 0x316   : > { %v2004_v19 = vadd.f32 %v2003_v32, %v1975_v29 }
 0x318   : > { %v2033_v57 = vadd.f32 %v2032_v0, %v2004_v19 }
 0x31a   : > { %v2050_v59 = vpack.c.bf16 %v2033_v57, %v3736_v51 }
 0x31c   : > { %2066 = vst [vmem:[%s3680_s8 + $0x78] sm:$0xff] %v2050_v59 }
 0x31d   : > { %3187 = shalt.err (!%p3184_p9)
}
 0x31e   : > { %s3253_s28 = smov 256   ;;  %s3254_s8 = smov 16  }
 0x31f   : > { %3027 = dma.vmem_to_hbm [thread:$0]  (%p3330_p4), %s2082_s16, 2048, %s2084_s17, %s2068_s24, %s3253_s28, %s3253_s28, %s3254_s8  }
 0x320 PF: > { %p3044_p10 = scmp.ge.s32.totalorder %s3246_s26, 2  ;;  %s2098_s14 = sand.u32 1, %s3226_s21  }
 0x321   : > { %s2099_s11 = scalar_lea.sflag [#allocation5], %s2098_s14 }
 0x322   : > { %p3037_p11 = pnand %p3044_p10, %p3337_p8 }
 0x324   : > { %p3038_p12 = pneg %p3037_p11 }
 0x326   : > { %3221 = dma.done.wait (%p3038_p12), %s2099_s11, 2048  }
 0x327   : > { %3223 = vsyncadd (%p3038_p12), %s2099_s11, 4294965248  ;;  %s21_s26 = sadd.s32 1, %s3246_s26   ;;  %s3812_s21 = smov %s3230_s22 }
 0x328   : > { %p18_p13 = scmp.ge.s32.totalorder %s21_s26, 4   ;;  %s3813_s22 = smov %s3234_s23 }
 0x329   : > { %s3814_s23 = smov %s3343_s10  ;;  %s3815_s24 = smov %s3242_s25 }
 0x32a   : > { %s3816_s25 = smov %s3818_s29  ;;  %20 = sbr.rel (!%p18_p13) target bundleno = 6 (0x6), region = 99 }
 0x32f   :  { %2105 = vsyncpa [#allocation4], 1 }
 0x330   :  { %2107 = vsyncpa [#allocation4 + $0x1], 1 }
 0x331   :  { %2108 = vsyncpa [#allocation7], 1 }
 0x332   :  { %2109 = vsyncpa [#allocation5], 1 }
 0x333   :  { %2111 = vsyncpa [#allocation5 + $0x1], 1 }

</bundles_post_ra>
